<compile_context>
chip_gen: v5e
topology: v5e:2x2
jax: 0.10.0
libtpu: 0.0.40
codegen_flags: <defaults>
</compile_context>

<pallas_src>
import jax
import jax.numpy as jnp
from jax import lax
from jax.experimental import pallas as pl
from jax.experimental.pallas import tpu as pltpu

_BN_EPS = 1e-5
_C_PAD = 128          # conv output channels padded to one 128-lane vreg width
                      # TODO(synk): use 256 output lanes on v6e/v7x when cout>=256
_TM_MAX = 512         # rows (N*Ho*Wo) per grid step (~85% of HBM roofline)
_VMEM_LIMIT = 48 * 1024 * 1024   # safe on v7x (64 MiB physical VMEM)


def _round_up(x, m):
    return ((x + m - 1) // m) * m


# -----------------------------------------------------------------------------
# Kernel A: conv-as-matmul (MXU, bf16 in / f32 acc) + batch-stat accumulation
# -----------------------------------------------------------------------------
def _conv_stats_kernel(p_ref, w_ref, out_ref, stats_ref):
    acc = jnp.dot(p_ref[...], w_ref[...], preferred_element_type=jnp.float32)
    out_ref[...] = acc.astype(out_ref.dtype)      # bf16 intermediate to HBM

    # Resident per-core statistics block: row 0 = sum, row 1 = sum of squares,
    # accumulated across the (arbitrary) M axis.  Padded M rows are all-zero
    # patches -> contribute 0; division by the *real* M happens in Kernel B,
    # so the statistics stay exact (do not "fix" this).
    @pl.when(pl.program_id(1) == 0)
    def _():
        stats_ref[...] = jnp.zeros_like(stats_ref)

    stats_ref[0:1, :] += jnp.sum(acc, axis=0, keepdims=True)
    stats_ref[1:2, :] += jnp.sum(acc * acc, axis=0, keepdims=True)


# -----------------------------------------------------------------------------
# Kernel B: folded BN apply (+residual) (+ReLU), written in place of conv_out
# -----------------------------------------------------------------------------
def _bn_apply_kernel(relu, add_residual, ncore, inv_m):
    def kernel(*refs):
        if add_residual:
            x_ref, stats_ref, gb_ref, res_ref, o_ref = refs
        else:
            x_ref, stats_ref, gb_ref, o_ref = refs

        s = stats_ref[0:1, :]
        ss = stats_ref[1:2, :]
        if ncore == 2:                       # merge the two per-core slots
            s = s + stats_ref[8:9, :]
            ss = ss + stats_ref[9:10, :]

        mu = s * inv_m
        var = jnp.maximum(ss * inv_m - mu * mu, 0.0)
        scale = gb_ref[0:1, :] * lax.rsqrt(var + _BN_EPS)   # gamma * rsqrt(var)
        shift = gb_ref[1:2, :] - mu * scale                 # beta - mu*scale

        y = x_ref[...].astype(jnp.float32) * scale + shift
        if add_residual:
            y = y + res_ref[...].astype(jnp.float32)
        if relu:
            y = jnp.maximum(y, 0.0)
        o_ref[...] = y.astype(o_ref.dtype)

    return kernel


# -----------------------------------------------------------------------------
# Wrapper: im2col + the two pallas_calls
# -----------------------------------------------------------------------------
def _im2col(x, k, stride, pad):
    """KxK patches of NHWC x (dtype preserved). Returns (M, K*K*C), Ho, Wo."""
    # TODO(synk): move patch extraction into Kernel A (halo / overlapping
    # BlockSpec reads) to remove the K^2 HBM blow-up of the patch matrix and
    # fuse the previous layer's BN-apply into the load path.
    if pad:
        x = jnp.pad(x, ((0, 0), (pad, pad), (pad, pad), (0, 0)))
    n, hp, wp, c = x.shape
    ho = (hp - k) // stride + 1
    wo = (wp - k) // stride + 1
    pieces = []
    for i in range(k):
        for j in range(k):
            pieces.append(
                x[:, i:i + stride * ho:stride, j:j + stride * wo:stride, :])
    p = jnp.stack(pieces, axis=-2)                 # (N, Ho, Wo, K*K, C)
    return p.reshape(n * ho * wo, k * k * c), ho, wo


def conv_bn_layer(x, layer, *, c_in, k, stride, padding, relu, residual=None):
    """Conv2d(no bias) + training-mode BN (+residual) (+ReLU).

    x:  (N, H, W, >=c_in) bf16, real data in the first c_in lanes.
    ->  (N, Ho, Wo, _C_PAD) bf16, real data in the first cout lanes,
        padded lanes exactly zero (gamma/beta are zero there).
    """
    n = x.shape[0]
    if x.shape[-1] != c_in:
        # Slice to the real input channels BEFORE im2col so the patch matrix
        # and the MXU K dimension only carry real data.
        x = x[..., :c_in]

    patches, ho, wo = _im2col(x, k, stride, padding)     # (M, k*k*c_in) bf16
    m, kkc = patches.shape
    tm = _TM_MAX if m >= _TM_MAX else _round_up(m, 16)   # 16: bf16 sublane pack
    m_pad = _round_up(m, tm)
    if m_pad != m:
        patches = jnp.pad(patches, ((0, m_pad - m), (0, 0)))
    mt = m_pad // tm

    # Leading "parallel" axis: on v7x each TensorCore handles half the M tiles
    # with its own stats slot; on single-TC v5e/v6e it is just a size-2 loop.
    ncore = 2 if mt % 2 == 0 else 1
    mt_in = mt // ncore

    # ---- Kernel A: tiled MXU matmul + batch-stat accumulation ---------------
    conv_out, stats = pl.pallas_call(
        _conv_stats_kernel,
        grid=(ncore, mt_in),
        in_specs=[
            pl.BlockSpec((tm, kkc), lambda c, i: (c * mt_in + i, 0)),
            pl.BlockSpec((kkc, _C_PAD), lambda c, i: (0, 0)),
        ],
        out_specs=(
            pl.BlockSpec((tm, _C_PAD), lambda c, i: (c * mt_in + i, 0)),
            pl.BlockSpec((8, _C_PAD), lambda c, i: (c, 0)),   # per-core slot
        ),
        out_shape=(
            jax.ShapeDtypeStruct((m_pad, _C_PAD), jnp.bfloat16),
            jax.ShapeDtypeStruct((8 * ncore, _C_PAD), jnp.float32),
        ),
        compiler_params=pltpu.CompilerParams(
            dimension_semantics=("parallel", "arbitrary"),
            vmem_limit_bytes=_VMEM_LIMIT),
    )(patches, layer["w_mat"])

    # ---- Kernel B: BN apply (+residual +ReLU), in-place over conv_out -------
    args = [conv_out, stats, layer["gb"]]
    in_specs = [
        pl.BlockSpec((tm, _C_PAD), lambda i: (i, 0)),
        pl.BlockSpec((8 * ncore, _C_PAD), lambda i: (0, 0)),
        pl.BlockSpec((8, _C_PAD), lambda i: (0, 0)),
    ]
    add_res = residual is not None
    if add_res:
        res = residual.reshape(-1, _C_PAD)
        if res.dtype != jnp.bfloat16:
            res = res.astype(jnp.bfloat16)
        if m_pad != m:
            res = jnp.pad(res, ((0, m_pad - m), (0, 0)))
        args.append(res)
        in_specs.append(pl.BlockSpec((tm, _C_PAD), lambda i: (i, 0)))

    out = pl.pallas_call(
        _bn_apply_kernel(relu, add_res, ncore, 1.0 / m),
        grid=(mt,),
        in_specs=in_specs,
        out_specs=pl.BlockSpec((tm, _C_PAD), lambda i: (i, 0)),
        out_shape=jax.ShapeDtypeStruct((m_pad, _C_PAD), jnp.bfloat16),
        input_output_aliases={0: 0},     # BN output overwrites conv_out buffer
        compiler_params=pltpu.CompilerParams(
            dimension_semantics=("parallel",),
            vmem_limit_bytes=_VMEM_LIMIT),
    )(*args)

    return out[:m].reshape(n, ho, wo, _C_PAD)


# -----------------------------------------------------------------------------
# Parameters (arrays only) + static config (Python ints only)
# -----------------------------------------------------------------------------
def _make_conv_layer(key, cin, cout, k):
    """Weights pre-transposed to (k*k*cin, 128) bf16; BN gamma/beta in (8,128)."""
    kw, kg, kb = jax.random.split(key, 3)
    w = 0.1 * jax.random.normal(kw, (cout, cin, k, k), jnp.float32)
    gamma = 1.0 + 0.1 * jax.random.normal(kg, (cout,), jnp.float32)
    beta = 0.05 * jax.random.normal(kb, (cout,), jnp.float32)
    # Conv bias intentionally dropped (cancelled by training-mode BN mean).
    w_t = jnp.transpose(w, (2, 3, 1, 0)).reshape(k * k * cin, cout)
    w_mat = jnp.zeros((k * k * cin, _C_PAD), jnp.float32)
    w_mat = w_mat.at[:, :cout].set(w_t).astype(jnp.bfloat16)
    gb = jnp.zeros((8, _C_PAD), jnp.float32)      # row0 gamma, row1 beta
    gb = gb.at[0, :cout].set(gamma)
    gb = gb.at[1, :cout].set(beta)                # padded lanes stay 0
    return {"w_mat": w_mat, "gb": gb}


def init_resnet(key, n_blocks, n_channels, img_channels, first_kernel_size):
    assert len(n_blocks) == len(n_channels)
    params, config = {}, {}
    key, k0 = jax.random.split(key)
    params["stem"] = _make_conv_layer(k0, img_channels, n_channels[0],
                                      first_kernel_size)
    config["stem"] = {"k": first_kernel_size, "stride": 2,
                      "pad": first_kernel_size // 2, "cin": img_channels}
    blocks_p, blocks_c = [], []
    prev = n_channels[0]
    first = True
    for i, ch in enumerate(n_channels):
        for j in range(n_blocks[i]):
            cin = prev if j == 0 else ch
            stride = 2 if first else 1
            first = False
            key, k1, k2, k3 = jax.random.split(key, 4)
            p = {"conv1": _make_conv_layer(k1, cin, ch, 3),
                 "conv2": _make_conv_layer(k2, ch, ch, 3)}
            c = {"stride": stride, "cin": cin, "cout": ch,
                 "has_shortcut": (stride != 1) or (cin != ch)}
            if c["has_shortcut"]:
                p["shortcut"] = _make_conv_layer(k3, cin, ch, 1)
            blocks_p.append(p)
            blocks_c.append(c)
        prev = ch
    params["blocks"] = blocks_p
    config["blocks"] = blocks_c
    config["c_last"] = n_channels[-1]
    return params, config


# -----------------------------------------------------------------------------
# Forward pass (config closed over statically; params/x are traced)
# -----------------------------------------------------------------------------
def make_forward(config):
    stem_cfg = config["stem"]
    blocks_cfg = config["blocks"]
    c_last = config["c_last"]

    def forward(params, x_nchw):
        # PyTorch NCHW -> NHWC once; activations carried in bf16 end-to-end.
        x = jnp.transpose(x_nchw, (0, 2, 3, 1)).astype(jnp.bfloat16)
        x = conv_bn_layer(x, params["stem"], c_in=stem_cfg["cin"],
                          k=stem_cfg["k"], stride=stem_cfg["stride"],
                          padding=stem_cfg["pad"], relu=True)
        for cfg, prm in zip(blocks_cfg, params["blocks"]):
            stride = cfg["stride"]
            if cfg["has_shortcut"]:
                sc = conv_bn_layer(x, prm["shortcut"], c_in=cfg["cin"], k=1,
                                   stride=stride, padding=0, relu=False)
            else:
                sc = x
            h = conv_bn_layer(x, prm["conv1"], c_in=cfg["cin"], k=3,
                              stride=stride, padding=1, relu=True)
            x = conv_bn_layer(h, prm["conv2"], c_in=cfg["cout"], k=3, stride=1,
                              padding=1, relu=True, residual=sc)
        # x.view(B, C, -1).mean(dim=1): channel mean of the tiny last
        # activation, done wrapper-side so kernel stores stay lane-dense.
        n, ho, wo, _ = x.shape
        feat = x[..., :c_last].astype(jnp.float32)
        return jnp.mean(feat, axis=-1).reshape(n, ho * wo)

    return forward


# -----------------------------------------------------------------------------
if __name__ == "__main__":
    n_blocks = [1, 1]
    n_channels = [8, 16]
    img_channels = 4
    first_kernel_size = 7

    key = jax.random.PRNGKey(0)
    kx, kp = jax.random.split(key)
    x = jax.random.normal(kx, (2, img_channels, 16, 16), jnp.float32)   # NCHW

    params, config = init_resnet(kp, n_blocks, n_channels, img_channels,
                                 first_kernel_size)

    fwd = jax.jit(make_forward(config))
    out = fwd(params, x)
    jax.block_until_ready(out)

    # 16x16 -> stem s2 -> 8x8 -> block0 s2 -> 4x4 -> block1 s1 -> 4x4
    assert out.shape == (2, 16), out.shape
    assert bool(jnp.all(jnp.isfinite(out)))
    print("KERNEL_OK")
</pallas_src>

<mosaic_0001>
module attributes {stable_mosaic.version = 11 : i64} {
  func.func @_conv_stats_kernel(%arg0: i32, %arg1: i32, %arg2: memref<128x196xbf16, #tpu.memory_space<vmem>>, %arg3: memref<196x128xbf16, #tpu.memory_space<vmem>>, %arg4: memref<128x128xbf16, #tpu.memory_space<vmem>>, %arg5: memref<8x128xf32, #tpu.memory_space<vmem>>) attributes {dimension_semantics = [#tpu.dimension_semantics<parallel>, #tpu.dimension_semantics<arbitrary>], iteration_bounds = array<i64: 1, 1>, scalar_prefetch = 0 : i64, scratch_operands = 0 : i64, tpu.core_type = #tpu.core_type<tc>, window_params = [{transform_indices = @transform_0, window_bounds = array<i64: 128, 196>}, {pipeline_mode = #tpu.pipeline_mode<synchronous>, transform_indices = @transform_1, window_bounds = array<i64: 196, 128>}, {transform_indices = @transform_2, window_bounds = array<i64: 128, 128>}, {transform_indices = @transform_3, window_bounds = array<i64: 8, 128>}]} {
    %c0 = arith.constant 0 : index
    %c0_0 = arith.constant 0 : index
    %0 = vector.load %arg2[%c0, %c0_0] : memref<128x196xbf16, #tpu.memory_space<vmem>>, vector<128x196xbf16>
    %c0_1 = arith.constant 0 : index
    %c0_2 = arith.constant 0 : index
    %1 = vector.load %arg3[%c0_1, %c0_2] : memref<196x128xbf16, #tpu.memory_space<vmem>>, vector<196x128xbf16>
    %cst = arith.constant dense<0.000000e+00> : vector<128x128xf32>
    %2 = tpu.matmul %0, %1, %cst {dimension_numbers = #tpu.dot_dimension_numbers<[1], [0], [0], [1], [0, 0, 1, 1], [], []>} : vector<128x196xbf16>, vector<196x128xbf16>, vector<128x128xf32> -> vector<128x128xf32>
    %3 = arith.truncf %2 : vector<128x128xf32> to vector<128x128xbf16>
    %c0_3 = arith.constant 0 : index
    %c0_4 = arith.constant 0 : index
    %4 = vector.load %arg4[%c0_3, %c0_4] : memref<128x128xbf16, #tpu.memory_space<vmem>>, vector<128x128xbf16>
    tpu.vector_store %arg4[%c0_3, %c0_4], %3 {strides = array<i32>} : memref<128x128xbf16, #tpu.memory_space<vmem>>, vector<128x128xbf16>,
    %c0_i32 = arith.constant 0 : i32
    %5 = arith.cmpi eq, %arg1, %c0_i32 : i32
    %6 = arith.extui %5 : i1 to i32
    %c0_i32_5 = arith.constant 0 : i32
    %7 = arith.cmpi ne, %6, %c0_i32_5 : i32
    scf.if %7 {
      %cst_15 = arith.constant 0.000000e+00 : f32
      %19 = vector.broadcast %cst_15 : f32 to vector<8x128xf32>
      %c0_16 = arith.constant 0 : index
      %c0_17 = arith.constant 0 : index
      %20 = vector.load %arg5[%c0_16, %c0_17] : memref<8x128xf32, #tpu.memory_space<vmem>>, vector<8x128xf32>
      tpu.vector_store %arg5[%c0_16, %c0_17], %19 {strides = array<i32>} : memref<8x128xf32, #tpu.memory_space<vmem>>, vector<8x128xf32>,
    } else {
    }
    %c0_6 = arith.constant 0 : index
    %c0_7 = arith.constant 0 : index
    %8 = vector.load %arg5[%c0_6, %c0_7] : memref<8x128xf32, #tpu.memory_space<vmem>>, vector<1x128xf32>
    %cst_8 = arith.constant dense<0.000000e+00> : vector<128xf32>
    %9 = vector.multi_reduction <add>, %2, %cst_8 [0] : vector<128x128xf32> to vector<128xf32>
    %10 = vector.shape_cast %9 : vector<128xf32> to vector<1x128xf32>
    %11 = arith.addf %8, %10 : vector<1x128xf32>
    %c0_9 = arith.constant 0 : index
    %c0_10 = arith.constant 0 : index
    %12 = vector.load %arg5[%c0_9, %c0_10] : memref<8x128xf32, #tpu.memory_space<vmem>>, vector<1x128xf32>
    tpu.vector_store %arg5[%c0_9, %c0_10], %11 {strides = array<i32>} : memref<8x128xf32, #tpu.memory_space<vmem>>, vector<1x128xf32>,
    %c1 = arith.constant 1 : index
    %c0_11 = arith.constant 0 : index
    %13 = vector.load %arg5[%c1, %c0_11] : memref<8x128xf32, #tpu.memory_space<vmem>>, vector<1x128xf32>
    %14 = arith.mulf %2, %2 : vector<128x128xf32>
    %cst_12 = arith.constant dense<0.000000e+00> : vector<128xf32>
    %15 = vector.multi_reduction <add>, %14, %cst_12 [0] : vector<128x128xf32> to vector<128xf32>
    %16 = vector.shape_cast %15 : vector<128xf32> to vector<1x128xf32>
    %17 = arith.addf %13, %16 : vector<1x128xf32>
    %c1_13 = arith.constant 1 : index
    %c0_14 = arith.constant 0 : index
    %18 = vector.load %arg5[%c1_13, %c0_14] : memref<8x128xf32, #tpu.memory_space<vmem>>, vector<1x128xf32>
    tpu.vector_store %arg5[%c1_13, %c0_14], %17 {strides = array<i32>} : memref<8x128xf32, #tpu.memory_space<vmem>>, vector<1x128xf32>,
    return
  }
  func.func @transform_0(%arg0: i32, %arg1: i32) -> (i32, i32) {
    %c1_i32 = arith.constant 1 : i32
    %0 = arith.muli %arg0, %c1_i32 : i32
    %1 = arith.addi %0, %arg1 : i32
    %c0_i32 = arith.constant 0 : i32
    %c0_i32_0 = arith.constant 0 : i32
    return %1, %c0_i32 : i32, i32
  }
  func.func @transform_1(%arg0: i32, %arg1: i32) -> (i32, i32) {
    %c0_i32 = arith.constant 0 : i32
    %c0_i32_0 = arith.constant 0 : i32
    %c0_i32_1 = arith.constant 0 : i32
    return %c0_i32, %c0_i32_0 : i32, i32
  }
  func.func @transform_2(%arg0: i32, %arg1: i32) -> (i32, i32) {
    %c1_i32 = arith.constant 1 : i32
    %0 = arith.muli %arg0, %c1_i32 : i32
    %1 = arith.addi %0, %arg1 : i32
    %c0_i32 = arith.constant 0 : i32
    %c0_i32_0 = arith.constant 0 : i32
    return %1, %c0_i32 : i32, i32
  }
  func.func @transform_3(%arg0: i32, %arg1: i32) -> (i32, i32) {
    %c0_i32 = arith.constant 0 : i32
    %c0_i32_0 = arith.constant 0 : i32
    return %arg0, %c0_i32 : i32, i32
  }
}

module attributes {stable_mosaic.version = 11 : i64} {
  func.func @kernel(%arg0: i32, %arg1: memref<128x128xbf16, #tpu.memory_space<vmem>>, %arg2: memref<8x128xf32, #tpu.memory_space<vmem>>, %arg3: memref<8x128xf32, #tpu.memory_space<vmem>>, %arg4: memref<128x128xbf16, #tpu.memory_space<vmem>>) attributes {dimension_semantics = [#tpu.dimension_semantics<parallel>], iteration_bounds = array<i64: 1>, scalar_prefetch = 0 : i64, scratch_operands = 0 : i64, tpu.core_type = #tpu.core_type<tc>, window_params = [{transform_indices = @transform_0, window_bounds = array<i64: 128, 128>}, {pipeline_mode = #tpu.pipeline_mode<synchronous>, transform_indices = @transform_1, window_bounds = array<i64: 8, 128>}, {pipeline_mode = #tpu.pipeline_mode<synchronous>, transform_indices = @transform_2, window_bounds = array<i64: 8, 128>}, {transform_indices = @transform_3, window_bounds = array<i64: 128, 128>}]} {
    %c0 = arith.constant 0 : index
    %c0_0 = arith.constant 0 : index
    %0 = vector.load %arg2[%c0, %c0_0] : memref<8x128xf32, #tpu.memory_space<vmem>>, vector<1x128xf32>
    %c1 = arith.constant 1 : index
    %c0_1 = arith.constant 0 : index
    %1 = vector.load %arg2[%c1, %c0_1] : memref<8x128xf32, #tpu.memory_space<vmem>>, vector<1x128xf32>
    %cst = arith.constant 7.812500e-03 : f32
    %2 = vector.broadcast %cst : f32 to vector<1x128xf32>
    %3 = arith.mulf %0, %2 : vector<1x128xf32>
    %cst_2 = arith.constant 7.812500e-03 : f32
    %4 = vector.broadcast %cst_2 : f32 to vector<1x128xf32>
    %5 = arith.mulf %1, %4 : vector<1x128xf32>
    %6 = arith.mulf %3, %3 : vector<1x128xf32>
    %7 = arith.subf %5, %6 : vector<1x128xf32>
    %cst_3 = arith.constant 0.000000e+00 : f32
    %8 = vector.broadcast %cst_3 : f32 to vector<1x128xf32>
    %9 = arith.maximumf %7, %8 : vector<1x128xf32>
    %c0_4 = arith.constant 0 : index
    %c0_5 = arith.constant 0 : index
    %10 = vector.load %arg3[%c0_4, %c0_5] : memref<8x128xf32, #tpu.memory_space<vmem>>, vector<1x128xf32>
    %cst_6 = arith.constant 9.99999974E-6 : f32
    %11 = vector.broadcast %cst_6 : f32 to vector<1x128xf32>
    %12 = arith.addf %9, %11 : vector<1x128xf32>
    %13 = math.rsqrt %12 : vector<1x128xf32>
    %14 = arith.mulf %10, %13 : vector<1x128xf32>
    %c1_7 = arith.constant 1 : index
    %c0_8 = arith.constant 0 : index
    %15 = vector.load %arg3[%c1_7, %c0_8] : memref<8x128xf32, #tpu.memory_space<vmem>>, vector<1x128xf32>
    %16 = arith.mulf %3, %14 : vector<1x128xf32>
    %17 = arith.subf %15, %16 : vector<1x128xf32>
    %c0_9 = arith.constant 0 : index
    %c0_10 = arith.constant 0 : index
    %18 = vector.load %arg1[%c0_9, %c0_10] : memref<128x128xbf16, #tpu.memory_space<vmem>>, vector<128x128xbf16>
    %19 = arith.extf %18 : vector<128x128xbf16> to vector<128x128xf32>
    %20 = vector.broadcast %14 : vector<1x128xf32> to vector<128x128xf32>
    %21 = arith.mulf %19, %20 : vector<128x128xf32>
    %22 = vector.broadcast %17 : vector<1x128xf32> to vector<128x128xf32>
    %23 = arith.addf %21, %22 : vector<128x128xf32>
    %cst_11 = arith.constant 0.000000e+00 : f32
    %24 = vector.broadcast %cst_11 : f32 to vector<128x128xf32>
    %25 = arith.maximumf %23, %24 : vector<128x128xf32>
    %26 = arith.truncf %25 : vector<128x128xf32> to vector<128x128xbf16>
    %c0_12 = arith.constant 0 : index
    %c0_13 = arith.constant 0 : index
    %27 = vector.load %arg4[%c0_12, %c0_13] : memref<128x128xbf16, #tpu.memory_space<vmem>>, vector<128x128xbf16>
    tpu.vector_store %arg4[%c0_12, %c0_13], %26 {strides = array<i32>} : memref<128x128xbf16, #tpu.memory_space<vmem>>, vector<128x128xbf16>,
    return
  }
  func.func @transform_0(%arg0: i32) -> (i32, i32) {
    %c0_i32 = arith.constant 0 : i32
    %c0_i32_0 = arith.constant 0 : i32
    return %arg0, %c0_i32 : i32, i32
  }
  func.func @transform_1(%arg0: i32) -> (i32, i32) {
    %c0_i32 = arith.constant 0 : i32
    %c0_i32_0 = arith.constant 0 : i32
    %c0_i32_1 = arith.constant 0 : i32
    return %c0_i32, %c0_i32_0 : i32, i32
  }
  func.func @transform_2(%arg0: i32) -> (i32, i32) {
    %c0_i32 = arith.constant 0 : i32
    %c0_i32_0 = arith.constant 0 : i32
    %c0_i32_1 = arith.constant 0 : i32
    return %c0_i32, %c0_i32_0 : i32, i32
  }
  func.func @transform_3(%arg0: i32) -> (i32, i32) {
    %c0_i32 = arith.constant 0 : i32
    %c0_i32_0 = arith.constant 0 : i32
    return %arg0, %c0_i32 : i32, i32
  }
}

module attributes {stable_mosaic.version = 11 : i64} {
  func.func @_conv_stats_kernel(%arg0: i32, %arg1: i32, %arg2: memref<32x8xbf16, #tpu.memory_space<vmem>>, %arg3: memref<8x128xbf16, #tpu.memory_space<vmem>>, %arg4: memref<32x128xbf16, #tpu.memory_space<vmem>>, %arg5: memref<8x128xf32, #tpu.memory_space<vmem>>) attributes {dimension_semantics = [#tpu.dimension_semantics<parallel>, #tpu.dimension_semantics<arbitrary>], iteration_bounds = array<i64: 1, 1>, scalar_prefetch = 0 : i64, scratch_operands = 0 : i64, tpu.core_type = #tpu.core_type<tc>, window_params = [{transform_indices = @transform_0, window_bounds = array<i64: 32, 8>}, {pipeline_mode = #tpu.pipeline_mode<synchronous>, transform_indices = @transform_1, window_bounds = array<i64: 8, 128>}, {transform_indices = @transform_2, window_bounds = array<i64: 32, 128>}, {transform_indices = @transform_3, window_bounds = array<i64: 8, 128>}]} {
    %c0 = arith.constant 0 : index
    %c0_0 = arith.constant 0 : index
    %0 = vector.load %arg2[%c0, %c0_0] : memref<32x8xbf16, #tpu.memory_space<vmem>>, vector<32x8xbf16>
    %c0_1 = arith.constant 0 : index
    %c0_2 = arith.constant 0 : index
    %1 = vector.load %arg3[%c0_1, %c0_2] : memref<8x128xbf16, #tpu.memory_space<vmem>>, vector<8x128xbf16>
    %cst = arith.constant dense<0.000000e+00> : vector<32x128xf32>
    %2 = tpu.matmul %0, %1, %cst {dimension_numbers = #tpu.dot_dimension_numbers<[1], [0], [0], [1], [0, 0, 1, 1], [], []>} : vector<32x8xbf16>, vector<8x128xbf16>, vector<32x128xf32> -> vector<32x128xf32>
    %3 = arith.truncf %2 : vector<32x128xf32> to vector<32x128xbf16>
    %c0_3 = arith.constant 0 : index
    %c0_4 = arith.constant 0 : index
    %4 = vector.load %arg4[%c0_3, %c0_4] : memref<32x128xbf16, #tpu.memory_space<vmem>>, vector<32x128xbf16>
    tpu.vector_store %arg4[%c0_3, %c0_4], %3 {strides = array<i32>} : memref<32x128xbf16, #tpu.memory_space<vmem>>, vector<32x128xbf16>,
    %c0_i32 = arith.constant 0 : i32
    %5 = arith.cmpi eq, %arg1, %c0_i32 : i32
    %6 = arith.extui %5 : i1 to i32
    %c0_i32_5 = arith.constant 0 : i32
    %7 = arith.cmpi ne, %6, %c0_i32_5 : i32
    scf.if %7 {
      %cst_15 = arith.constant 0.000000e+00 : f32
      %19 = vector.broadcast %cst_15 : f32 to vector<8x128xf32>
      %c0_16 = arith.constant 0 : index
      %c0_17 = arith.constant 0 : index
      %20 = vector.load %arg5[%c0_16, %c0_17] : memref<8x128xf32, #tpu.memory_space<vmem>>, vector<8x128xf32>
      tpu.vector_store %arg5[%c0_16, %c0_17], %19 {strides = array<i32>} : memref<8x128xf32, #tpu.memory_space<vmem>>, vector<8x128xf32>,
    } else {
    }
    %c0_6 = arith.constant 0 : index
    %c0_7 = arith.constant 0 : index
    %8 = vector.load %arg5[%c0_6, %c0_7] : memref<8x128xf32, #tpu.memory_space<vmem>>, vector<1x128xf32>
    %cst_8 = arith.constant dense<0.000000e+00> : vector<128xf32>
    %9 = vector.multi_reduction <add>, %2, %cst_8 [0] : vector<32x128xf32> to vector<128xf32>
    %10 = vector.shape_cast %9 : vector<128xf32> to vector<1x128xf32>
    %11 = arith.addf %8, %10 : vector<1x128xf32>
    %c0_9 = arith.constant 0 : index
    %c0_10 = arith.constant 0 : index
    %12 = vector.load %arg5[%c0_9, %c0_10] : memref<8x128xf32, #tpu.memory_space<vmem>>, vector<1x128xf32>
    tpu.vector_store %arg5[%c0_9, %c0_10], %11 {strides = array<i32>} : memref<8x128xf32, #tpu.memory_space<vmem>>, vector<1x128xf32>,
    %c1 = arith.constant 1 : index
    %c0_11 = arith.constant 0 : index
    %13 = vector.load %arg5[%c1, %c0_11] : memref<8x128xf32, #tpu.memory_space<vmem>>, vector<1x128xf32>
    %14 = arith.mulf %2, %2 : vector<32x128xf32>
    %cst_12 = arith.constant dense<0.000000e+00> : vector<128xf32>
    %15 = vector.multi_reduction <add>, %14, %cst_12 [0] : vector<32x128xf32> to vector<128xf32>
    %16 = vector.shape_cast %15 : vector<128xf32> to vector<1x128xf32>
    %17 = arith.addf %13, %16 : vector<1x128xf32>
    %c1_13 = arith.constant 1 : index
    %c0_14 = arith.constant 0 : index
    %18 = vector.load %arg5[%c1_13, %c0_14] : memref<8x128xf32, #tpu.memory_space<vmem>>, vector<1x128xf32>
    tpu.vector_store %arg5[%c1_13, %c0_14], %17 {strides = array<i32>} : memref<8x128xf32, #tpu.memory_space<vmem>>, vector<1x128xf32>,
    return
  }
  func.func @transform_0(%arg0: i32, %arg1: i32) -> (i32, i32) {
    %c1_i32 = arith.constant 1 : i32
    %0 = arith.muli %arg0, %c1_i32 : i32
    %1 = arith.addi %0, %arg1 : i32
    %c0_i32 = arith.constant 0 : i32
    %c0_i32_0 = arith.constant 0 : i32
    return %1, %c0_i32 : i32, i32
  }
  func.func @transform_1(%arg0: i32, %arg1: i32) -> (i32, i32) {
    %c0_i32 = arith.constant 0 : i32
    %c0_i32_0 = arith.constant 0 : i32
    %c0_i32_1 = arith.constant 0 : i32
    return %c0_i32, %c0_i32_0 : i32, i32
  }
  func.func @transform_2(%arg0: i32, %arg1: i32) -> (i32, i32) {
    %c1_i32 = arith.constant 1 : i32
    %0 = arith.muli %arg0, %c1_i32 : i32
    %1 = arith.addi %0, %arg1 : i32
    %c0_i32 = arith.constant 0 : i32
    %c0_i32_0 = arith.constant 0 : i32
    return %1, %c0_i32 : i32, i32
  }
  func.func @transform_3(%arg0: i32, %arg1: i32) -> (i32, i32) {
    %c0_i32 = arith.constant 0 : i32
    %c0_i32_0 = arith.constant 0 : i32
    return %arg0, %c0_i32 : i32, i32
  }
}

module attributes {stable_mosaic.version = 11 : i64} {
  func.func @kernel(%arg0: i32, %arg1: memref<32x128xbf16, #tpu.memory_space<vmem>>, %arg2: memref<8x128xf32, #tpu.memory_space<vmem>>, %arg3: memref<8x128xf32, #tpu.memory_space<vmem>>, %arg4: memref<32x128xbf16, #tpu.memory_space<vmem>>) attributes {dimension_semantics = [#tpu.dimension_semantics<parallel>], iteration_bounds = array<i64: 1>, scalar_prefetch = 0 : i64, scratch_operands = 0 : i64, tpu.core_type = #tpu.core_type<tc>, window_params = [{transform_indices = @transform_0, window_bounds = array<i64: 32, 128>}, {pipeline_mode = #tpu.pipeline_mode<synchronous>, transform_indices = @transform_1, window_bounds = array<i64: 8, 128>}, {pipeline_mode = #tpu.pipeline_mode<synchronous>, transform_indices = @transform_2, window_bounds = array<i64: 8, 128>}, {transform_indices = @transform_3, window_bounds = array<i64: 32, 128>}]} {
    %c0 = arith.constant 0 : index
    %c0_0 = arith.constant 0 : index
    %0 = vector.load %arg2[%c0, %c0_0] : memref<8x128xf32, #tpu.memory_space<vmem>>, vector<1x128xf32>
    %c1 = arith.constant 1 : index
    %c0_1 = arith.constant 0 : index
    %1 = vector.load %arg2[%c1, %c0_1] : memref<8x128xf32, #tpu.memory_space<vmem>>, vector<1x128xf32>
    %cst = arith.constant 3.125000e-02 : f32
    %2 = vector.broadcast %cst : f32 to vector<1x128xf32>
    %3 = arith.mulf %0, %2 : vector<1x128xf32>
    %cst_2 = arith.constant 3.125000e-02 : f32
    %4 = vector.broadcast %cst_2 : f32 to vector<1x128xf32>
    %5 = arith.mulf %1, %4 : vector<1x128xf32>
    %6 = arith.mulf %3, %3 : vector<1x128xf32>
    %7 = arith.subf %5, %6 : vector<1x128xf32>
    %cst_3 = arith.constant 0.000000e+00 : f32
    %8 = vector.broadcast %cst_3 : f32 to vector<1x128xf32>
    %9 = arith.maximumf %7, %8 : vector<1x128xf32>
    %c0_4 = arith.constant 0 : index
    %c0_5 = arith.constant 0 : index
    %10 = vector.load %arg3[%c0_4, %c0_5] : memref<8x128xf32, #tpu.memory_space<vmem>>, vector<1x128xf32>
    %cst_6 = arith.constant 9.99999974E-6 : f32
    %11 = vector.broadcast %cst_6 : f32 to vector<1x128xf32>
    %12 = arith.addf %9, %11 : vector<1x128xf32>
    %13 = math.rsqrt %12 : vector<1x128xf32>
    %14 = arith.mulf %10, %13 : vector<1x128xf32>
    %c1_7 = arith.constant 1 : index
    %c0_8 = arith.constant 0 : index
    %15 = vector.load %arg3[%c1_7, %c0_8] : memref<8x128xf32, #tpu.memory_space<vmem>>, vector<1x128xf32>
    %16 = arith.mulf %3, %14 : vector<1x128xf32>
    %17 = arith.subf %15, %16 : vector<1x128xf32>
    %c0_9 = arith.constant 0 : index
    %c0_10 = arith.constant 0 : index
    %18 = vector.load %arg1[%c0_9, %c0_10] : memref<32x128xbf16, #tpu.memory_space<vmem>>, vector<32x128xbf16>
    %19 = arith.extf %18 : vector<32x128xbf16> to vector<32x128xf32>
    %20 = vector.broadcast %14 : vector<1x128xf32> to vector<32x128xf32>
    %21 = arith.mulf %19, %20 : vector<32x128xf32>
    %22 = vector.broadcast %17 : vector<1x128xf32> to vector<32x128xf32>
    %23 = arith.addf %21, %22 : vector<32x128xf32>
    %24 = arith.truncf %23 : vector<32x128xf32> to vector<32x128xbf16>
    %c0_11 = arith.constant 0 : index
    %c0_12 = arith.constant 0 : index
    %25 = vector.load %arg4[%c0_11, %c0_12] : memref<32x128xbf16, #tpu.memory_space<vmem>>, vector<32x128xbf16>
    tpu.vector_store %arg4[%c0_11, %c0_12], %24 {strides = array<i32>} : memref<32x128xbf16, #tpu.memory_space<vmem>>, vector<32x128xbf16>,
    return
  }
  func.func @transform_0(%arg0: i32) -> (i32, i32) {
    %c0_i32 = arith.constant 0 : i32
    %c0_i32_0 = arith.constant 0 : i32
    return %arg0, %c0_i32 : i32, i32
  }
  func.func @transform_1(%arg0: i32) -> (i32, i32) {
    %c0_i32 = arith.constant 0 : i32
    %c0_i32_0 = arith.constant 0 : i32
    %c0_i32_1 = arith.constant 0 : i32
    return %c0_i32, %c0_i32_0 : i32, i32
  }
  func.func @transform_2(%arg0: i32) -> (i32, i32) {
    %c0_i32 = arith.constant 0 : i32
    %c0_i32_0 = arith.constant 0 : i32
    %c0_i32_1 = arith.constant 0 : i32
    return %c0_i32, %c0_i32_0 : i32, i32
  }
  func.func @transform_3(%arg0: i32) -> (i32, i32) {
    %c0_i32 = arith.constant 0 : i32
    %c0_i32_0 = arith.constant 0 : i32
    return %arg0, %c0_i32 : i32, i32
  }
}

module attributes {stable_mosaic.version = 11 : i64} {
  func.func @_conv_stats_kernel(%arg0: i32, %arg1: i32, %arg2: memref<32x72xbf16, #tpu.memory_space<vmem>>, %arg3: memref<72x128xbf16, #tpu.memory_space<vmem>>, %arg4: memref<32x128xbf16, #tpu.memory_space<vmem>>, %arg5: memref<8x128xf32, #tpu.memory_space<vmem>>) attributes {dimension_semantics = [#tpu.dimension_semantics<parallel>, #tpu.dimension_semantics<arbitrary>], iteration_bounds = array<i64: 1, 1>, scalar_prefetch = 0 : i64, scratch_operands = 0 : i64, tpu.core_type = #tpu.core_type<tc>, window_params = [{transform_indices = @transform_0, window_bounds = array<i64: 32, 72>}, {pipeline_mode = #tpu.pipeline_mode<synchronous>, transform_indices = @transform_1, window_bounds = array<i64: 72, 128>}, {transform_indices = @transform_2, window_bounds = array<i64: 32, 128>}, {transform_indices = @transform_3, window_bounds = array<i64: 8, 128>}]} {
    %c0 = arith.constant 0 : index
    %c0_0 = arith.constant 0 : index
    %0 = vector.load %arg2[%c0, %c0_0] : memref<32x72xbf16, #tpu.memory_space<vmem>>, vector<32x72xbf16>
    %c0_1 = arith.constant 0 : index
    %c0_2 = arith.constant 0 : index
    %1 = vector.load %arg3[%c0_1, %c0_2] : memref<72x128xbf16, #tpu.memory_space<vmem>>, vector<72x128xbf16>
    %cst = arith.constant dense<0.000000e+00> : vector<32x128xf32>
    %2 = tpu.matmul %0, %1, %cst {dimension_numbers = #tpu.dot_dimension_numbers<[1], [0], [0], [1], [0, 0, 1, 1], [], []>} : vector<32x72xbf16>, vector<72x128xbf16>, vector<32x128xf32> -> vector<32x128xf32>
    %3 = arith.truncf %2 : vector<32x128xf32> to vector<32x128xbf16>
    %c0_3 = arith.constant 0 : index
    %c0_4 = arith.constant 0 : index
    %4 = vector.load %arg4[%c0_3, %c0_4] : memref<32x128xbf16, #tpu.memory_space<vmem>>, vector<32x128xbf16>
    tpu.vector_store %arg4[%c0_3, %c0_4], %3 {strides = array<i32>} : memref<32x128xbf16, #tpu.memory_space<vmem>>, vector<32x128xbf16>,
    %c0_i32 = arith.constant 0 : i32
    %5 = arith.cmpi eq, %arg1, %c0_i32 : i32
    %6 = arith.extui %5 : i1 to i32
    %c0_i32_5 = arith.constant 0 : i32
    %7 = arith.cmpi ne, %6, %c0_i32_5 : i32
    scf.if %7 {
      %cst_15 = arith.constant 0.000000e+00 : f32
      %19 = vector.broadcast %cst_15 : f32 to vector<8x128xf32>
      %c0_16 = arith.constant 0 : index
      %c0_17 = arith.constant 0 : index
      %20 = vector.load %arg5[%c0_16, %c0_17] : memref<8x128xf32, #tpu.memory_space<vmem>>, vector<8x128xf32>
      tpu.vector_store %arg5[%c0_16, %c0_17], %19 {strides = array<i32>} : memref<8x128xf32, #tpu.memory_space<vmem>>, vector<8x128xf32>,
    } else {
    }
    %c0_6 = arith.constant 0 : index
    %c0_7 = arith.constant 0 : index
    %8 = vector.load %arg5[%c0_6, %c0_7] : memref<8x128xf32, #tpu.memory_space<vmem>>, vector<1x128xf32>
    %cst_8 = arith.constant dense<0.000000e+00> : vector<128xf32>
    %9 = vector.multi_reduction <add>, %2, %cst_8 [0] : vector<32x128xf32> to vector<128xf32>
    %10 = vector.shape_cast %9 : vector<128xf32> to vector<1x128xf32>
    %11 = arith.addf %8, %10 : vector<1x128xf32>
    %c0_9 = arith.constant 0 : index
    %c0_10 = arith.constant 0 : index
    %12 = vector.load %arg5[%c0_9, %c0_10] : memref<8x128xf32, #tpu.memory_space<vmem>>, vector<1x128xf32>
    tpu.vector_store %arg5[%c0_9, %c0_10], %11 {strides = array<i32>} : memref<8x128xf32, #tpu.memory_space<vmem>>, vector<1x128xf32>,
    %c1 = arith.constant 1 : index
    %c0_11 = arith.constant 0 : index
    %13 = vector.load %arg5[%c1, %c0_11] : memref<8x128xf32, #tpu.memory_space<vmem>>, vector<1x128xf32>
    %14 = arith.mulf %2, %2 : vector<32x128xf32>
    %cst_12 = arith.constant dense<0.000000e+00> : vector<128xf32>
    %15 = vector.multi_reduction <add>, %14, %cst_12 [0] : vector<32x128xf32> to vector<128xf32>
    %16 = vector.shape_cast %15 : vector<128xf32> to vector<1x128xf32>
    %17 = arith.addf %13, %16 : vector<1x128xf32>
    %c1_13 = arith.constant 1 : index
    %c0_14 = arith.constant 0 : index
    %18 = vector.load %arg5[%c1_13, %c0_14] : memref<8x128xf32, #tpu.memory_space<vmem>>, vector<1x128xf32>
    tpu.vector_store %arg5[%c1_13, %c0_14], %17 {strides = array<i32>} : memref<8x128xf32, #tpu.memory_space<vmem>>, vector<1x128xf32>,
    return
  }
  func.func @transform_0(%arg0: i32, %arg1: i32) -> (i32, i32) {
    %c1_i32 = arith.constant 1 : i32
    %0 = arith.muli %arg0, %c1_i32 : i32
    %1 = arith.addi %0, %arg1 : i32
    %c0_i32 = arith.constant 0 : i32
    %c0_i32_0 = arith.constant 0 : i32
    return %1, %c0_i32 : i32, i32
  }
  func.func @transform_1(%arg0: i32, %arg1: i32) -> (i32, i32) {
    %c0_i32 = arith.constant 0 : i32
    %c0_i32_0 = arith.constant 0 : i32
    %c0_i32_1 = arith.constant 0 : i32
    return %c0_i32, %c0_i32_0 : i32, i32
  }
  func.func @transform_2(%arg0: i32, %arg1: i32) -> (i32, i32) {
    %c1_i32 = arith.constant 1 : i32
    %0 = arith.muli %arg0, %c1_i32 : i32
    %1 = arith.addi %0, %arg1 : i32
    %c0_i32 = arith.constant 0 : i32
    %c0_i32_0 = arith.constant 0 : i32
    return %1, %c0_i32 : i32, i32
  }
  func.func @transform_3(%arg0: i32, %arg1: i32) -> (i32, i32) {
    %c0_i32 = arith.constant 0 : i32
    %c0_i32_0 = arith.constant 0 : i32
    return %arg0, %c0_i32 : i32, i32
  }
}

module attributes {stable_mosaic.version = 11 : i64} {
  func.func @kernel(%arg0: i32, %arg1: memref<32x128xbf16, #tpu.memory_space<vmem>>, %arg2: memref<8x128xf32, #tpu.memory_space<vmem>>, %arg3: memref<8x128xf32, #tpu.memory_space<vmem>>, %arg4: memref<32x128xbf16, #tpu.memory_space<vmem>>) attributes {dimension_semantics = [#tpu.dimension_semantics<parallel>], iteration_bounds = array<i64: 1>, scalar_prefetch = 0 : i64, scratch_operands = 0 : i64, tpu.core_type = #tpu.core_type<tc>, window_params = [{transform_indices = @transform_0, window_bounds = array<i64: 32, 128>}, {pipeline_mode = #tpu.pipeline_mode<synchronous>, transform_indices = @transform_1, window_bounds = array<i64: 8, 128>}, {pipeline_mode = #tpu.pipeline_mode<synchronous>, transform_indices = @transform_2, window_bounds = array<i64: 8, 128>}, {transform_indices = @transform_3, window_bounds = array<i64: 32, 128>}]} {
    %c0 = arith.constant 0 : index
    %c0_0 = arith.constant 0 : index
    %0 = vector.load %arg2[%c0, %c0_0] : memref<8x128xf32, #tpu.memory_space<vmem>>, vector<1x128xf32>
    %c1 = arith.constant 1 : index
    %c0_1 = arith.constant 0 : index
    %1 = vector.load %arg2[%c1, %c0_1] : memref<8x128xf32, #tpu.memory_space<vmem>>, vector<1x128xf32>
    %cst = arith.constant 3.125000e-02 : f32
    %2 = vector.broadcast %cst : f32 to vector<1x128xf32>
    %3 = arith.mulf %0, %2 : vector<1x128xf32>
    %cst_2 = arith.constant 3.125000e-02 : f32
    %4 = vector.broadcast %cst_2 : f32 to vector<1x128xf32>
    %5 = arith.mulf %1, %4 : vector<1x128xf32>
    %6 = arith.mulf %3, %3 : vector<1x128xf32>
    %7 = arith.subf %5, %6 : vector<1x128xf32>
    %cst_3 = arith.constant 0.000000e+00 : f32
    %8 = vector.broadcast %cst_3 : f32 to vector<1x128xf32>
    %9 = arith.maximumf %7, %8 : vector<1x128xf32>
    %c0_4 = arith.constant 0 : index
    %c0_5 = arith.constant 0 : index
    %10 = vector.load %arg3[%c0_4, %c0_5] : memref<8x128xf32, #tpu.memory_space<vmem>>, vector<1x128xf32>
    %cst_6 = arith.constant 9.99999974E-6 : f32
    %11 = vector.broadcast %cst_6 : f32 to vector<1x128xf32>
    %12 = arith.addf %9, %11 : vector<1x128xf32>
    %13 = math.rsqrt %12 : vector<1x128xf32>
    %14 = arith.mulf %10, %13 : vector<1x128xf32>
    %c1_7 = arith.constant 1 : index
    %c0_8 = arith.constant 0 : index
    %15 = vector.load %arg3[%c1_7, %c0_8] : memref<8x128xf32, #tpu.memory_space<vmem>>, vector<1x128xf32>
    %16 = arith.mulf %3, %14 : vector<1x128xf32>
    %17 = arith.subf %15, %16 : vector<1x128xf32>
    %c0_9 = arith.constant 0 : index
    %c0_10 = arith.constant 0 : index
    %18 = vector.load %arg1[%c0_9, %c0_10] : memref<32x128xbf16, #tpu.memory_space<vmem>>, vector<32x128xbf16>
    %19 = arith.extf %18 : vector<32x128xbf16> to vector<32x128xf32>
    %20 = vector.broadcast %14 : vector<1x128xf32> to vector<32x128xf32>
    %21 = arith.mulf %19, %20 : vector<32x128xf32>
    %22 = vector.broadcast %17 : vector<1x128xf32> to vector<32x128xf32>
    %23 = arith.addf %21, %22 : vector<32x128xf32>
    %cst_11 = arith.constant 0.000000e+00 : f32
    %24 = vector.broadcast %cst_11 : f32 to vector<32x128xf32>
    %25 = arith.maximumf %23, %24 : vector<32x128xf32>
    %26 = arith.truncf %25 : vector<32x128xf32> to vector<32x128xbf16>
    %c0_12 = arith.constant 0 : index
    %c0_13 = arith.constant 0 : index
    %27 = vector.load %arg4[%c0_12, %c0_13] : memref<32x128xbf16, #tpu.memory_space<vmem>>, vector<32x128xbf16>
    tpu.vector_store %arg4[%c0_12, %c0_13], %26 {strides = array<i32>} : memref<32x128xbf16, #tpu.memory_space<vmem>>, vector<32x128xbf16>,
    return
  }
  func.func @transform_0(%arg0: i32) -> (i32, i32) {
    %c0_i32 = arith.constant 0 : i32
    %c0_i32_0 = arith.constant 0 : i32
    return %arg0, %c0_i32 : i32, i32
  }
  func.func @transform_1(%arg0: i32) -> (i32, i32) {
    %c0_i32 = arith.constant 0 : i32
    %c0_i32_0 = arith.constant 0 : i32
    %c0_i32_1 = arith.constant 0 : i32
    return %c0_i32, %c0_i32_0 : i32, i32
  }
  func.func @transform_2(%arg0: i32) -> (i32, i32) {
    %c0_i32 = arith.constant 0 : i32
    %c0_i32_0 = arith.constant 0 : i32
    %c0_i32_1 = arith.constant 0 : i32
    return %c0_i32, %c0_i32_0 : i32, i32
  }
  func.func @transform_3(%arg0: i32) -> (i32, i32) {
    %c0_i32 = arith.constant 0 : i32
    %c0_i32_0 = arith.constant 0 : i32
    return %arg0, %c0_i32 : i32, i32
  }
}

module attributes {stable_mosaic.version = 11 : i64} {
  func.func @kernel(%arg0: i32, %arg1: memref<32x128xbf16, #tpu.memory_space<vmem>>, %arg2: memref<8x128xf32, #tpu.memory_space<vmem>>, %arg3: memref<8x128xf32, #tpu.memory_space<vmem>>, %arg4: memref<32x128xbf16, #tpu.memory_space<vmem>>, %arg5: memref<32x128xbf16, #tpu.memory_space<vmem>>) attributes {dimension_semantics = [#tpu.dimension_semantics<parallel>], iteration_bounds = array<i64: 1>, scalar_prefetch = 0 : i64, scratch_operands = 0 : i64, tpu.core_type = #tpu.core_type<tc>, window_params = [{transform_indices = @transform_0, window_bounds = array<i64: 32, 128>}, {pipeline_mode = #tpu.pipeline_mode<synchronous>, transform_indices = @transform_1, window_bounds = array<i64: 8, 128>}, {pipeline_mode = #tpu.pipeline_mode<synchronous>, transform_indices = @transform_2, window_bounds = array<i64: 8, 128>}, {transform_indices = @transform_3, window_bounds = array<i64: 32, 128>}, {transform_indices = @transform_4, window_bounds = array<i64: 32, 128>}]} {
    %c0 = arith.constant 0 : index
    %c0_0 = arith.constant 0 : index
    %0 = vector.load %arg2[%c0, %c0_0] : memref<8x128xf32, #tpu.memory_space<vmem>>, vector<1x128xf32>
    %c1 = arith.constant 1 : index
    %c0_1 = arith.constant 0 : index
    %1 = vector.load %arg2[%c1, %c0_1] : memref<8x128xf32, #tpu.memory_space<vmem>>, vector<1x128xf32>
    %cst = arith.constant 3.125000e-02 : f32
    %2 = vector.broadcast %cst : f32 to vector<1x128xf32>
    %3 = arith.mulf %0, %2 : vector<1x128xf32>
    %cst_2 = arith.constant 3.125000e-02 : f32
    %4 = vector.broadcast %cst_2 : f32 to vector<1x128xf32>
    %5 = arith.mulf %1, %4 : vector<1x128xf32>
    %6 = arith.mulf %3, %3 : vector<1x128xf32>
    %7 = arith.subf %5, %6 : vector<1x128xf32>
    %cst_3 = arith.constant 0.000000e+00 : f32
    %8 = vector.broadcast %cst_3 : f32 to vector<1x128xf32>
    %9 = arith.maximumf %7, %8 : vector<1x128xf32>
    %c0_4 = arith.constant 0 : index
    %c0_5 = arith.constant 0 : index
    %10 = vector.load %arg3[%c0_4, %c0_5] : memref<8x128xf32, #tpu.memory_space<vmem>>, vector<1x128xf32>
    %cst_6 = arith.constant 9.99999974E-6 : f32
    %11 = vector.broadcast %cst_6 : f32 to vector<1x128xf32>
    %12 = arith.addf %9, %11 : vector<1x128xf32>
    %13 = math.rsqrt %12 : vector<1x128xf32>
    %14 = arith.mulf %10, %13 : vector<1x128xf32>
    %c1_7 = arith.constant 1 : index
    %c0_8 = arith.constant 0 : index
    %15 = vector.load %arg3[%c1_7, %c0_8] : memref<8x128xf32, #tpu.memory_space<vmem>>, vector<1x128xf32>
    %16 = arith.mulf %3, %14 : vector<1x128xf32>
    %17 = arith.subf %15, %16 : vector<1x128xf32>
    %c0_9 = arith.constant 0 : index
    %c0_10 = arith.constant 0 : index
    %18 = vector.load %arg1[%c0_9, %c0_10] : memref<32x128xbf16, #tpu.memory_space<vmem>>, vector<32x128xbf16>
    %19 = arith.extf %18 : vector<32x128xbf16> to vector<32x128xf32>
    %20 = vector.broadcast %14 : vector<1x128xf32> to vector<32x128xf32>
    %21 = arith.mulf %19, %20 : vector<32x128xf32>
    %22 = vector.broadcast %17 : vector<1x128xf32> to vector<32x128xf32>
    %23 = arith.addf %21, %22 : vector<32x128xf32>
    %c0_11 = arith.constant 0 : index
    %c0_12 = arith.constant 0 : index
    %24 = vector.load %arg4[%c0_11, %c0_12] : memref<32x128xbf16, #tpu.memory_space<vmem>>, vector<32x128xbf16>
    %25 = arith.extf %24 : vector<32x128xbf16> to vector<32x128xf32>
    %26 = arith.addf %23, %25 : vector<32x128xf32>
    %cst_13 = arith.constant 0.000000e+00 : f32
    %27 = vector.broadcast %cst_13 : f32 to vector<32x128xf32>
    %28 = arith.maximumf %26, %27 : vector<32x128xf32>
    %29 = arith.truncf %28 : vector<32x128xf32> to vector<32x128xbf16>
    %c0_14 = arith.constant 0 : index
    %c0_15 = arith.constant 0 : index
    %30 = vector.load %arg5[%c0_14, %c0_15] : memref<32x128xbf16, #tpu.memory_space<vmem>>, vector<32x128xbf16>
    tpu.vector_store %arg5[%c0_14, %c0_15], %29 {strides = array<i32>} : memref<32x128xbf16, #tpu.memory_space<vmem>>, vector<32x128xbf16>,
    return
  }
  func.func @transform_0(%arg0: i32) -> (i32, i32) {
    %c0_i32 = arith.constant 0 : i32
    %c0_i32_0 = arith.constant 0 : i32
    return %arg0, %c0_i32 : i32, i32
  }
  func.func @transform_1(%arg0: i32) -> (i32, i32) {
    %c0_i32 = arith.constant 0 : i32
    %c0_i32_0 = arith.constant 0 : i32
    %c0_i32_1 = arith.constant 0 : i32
    return %c0_i32, %c0_i32_0 : i32, i32
  }
  func.func @transform_2(%arg0: i32) -> (i32, i32) {
    %c0_i32 = arith.constant 0 : i32
    %c0_i32_0 = arith.constant 0 : i32
    %c0_i32_1 = arith.constant 0 : i32
    return %c0_i32, %c0_i32_0 : i32, i32
  }
  func.func @transform_3(%arg0: i32) -> (i32, i32) {
    %c0_i32 = arith.constant 0 : i32
    %c0_i32_0 = arith.constant 0 : i32
    return %arg0, %c0_i32 : i32, i32
  }
  func.func @transform_4(%arg0: i32) -> (i32, i32) {
    %c0_i32 = arith.constant 0 : i32
    %c0_i32_0 = arith.constant 0 : i32
    return %arg0, %c0_i32 : i32, i32
  }
}

module attributes {stable_mosaic.version = 11 : i64} {
  func.func @_conv_stats_kernel(%arg0: i32, %arg1: i32, %arg2: memref<32x144xbf16, #tpu.memory_space<vmem>>, %arg3: memref<144x128xbf16, #tpu.memory_space<vmem>>, %arg4: memref<32x128xbf16, #tpu.memory_space<vmem>>, %arg5: memref<8x128xf32, #tpu.memory_space<vmem>>) attributes {dimension_semantics = [#tpu.dimension_semantics<parallel>, #tpu.dimension_semantics<arbitrary>], iteration_bounds = array<i64: 1, 1>, scalar_prefetch = 0 : i64, scratch_operands = 0 : i64, tpu.core_type = #tpu.core_type<tc>, window_params = [{transform_indices = @transform_0, window_bounds = array<i64: 32, 144>}, {pipeline_mode = #tpu.pipeline_mode<synchronous>, transform_indices = @transform_1, window_bounds = array<i64: 144, 128>}, {transform_indices = @transform_2, window_bounds = array<i64: 32, 128>}, {transform_indices = @transform_3, window_bounds = array<i64: 8, 128>}]} {
    %c0 = arith.constant 0 : index
    %c0_0 = arith.constant 0 : index
    %0 = vector.load %arg2[%c0, %c0_0] : memref<32x144xbf16, #tpu.memory_space<vmem>>, vector<32x144xbf16>
    %c0_1 = arith.constant 0 : index
    %c0_2 = arith.constant 0 : index
    %1 = vector.load %arg3[%c0_1, %c0_2] : memref<144x128xbf16, #tpu.memory_space<vmem>>, vector<144x128xbf16>
    %cst = arith.constant dense<0.000000e+00> : vector<32x128xf32>
    %2 = tpu.matmul %0, %1, %cst {dimension_numbers = #tpu.dot_dimension_numbers<[1], [0], [0], [1], [0, 0, 1, 1], [], []>} : vector<32x144xbf16>, vector<144x128xbf16>, vector<32x128xf32> -> vector<32x128xf32>
    %3 = arith.truncf %2 : vector<32x128xf32> to vector<32x128xbf16>
    %c0_3 = arith.constant 0 : index
    %c0_4 = arith.constant 0 : index
    %4 = vector.load %arg4[%c0_3, %c0_4] : memref<32x128xbf16, #tpu.memory_space<vmem>>, vector<32x128xbf16>
    tpu.vector_store %arg4[%c0_3, %c0_4], %3 {strides = array<i32>} : memref<32x128xbf16, #tpu.memory_space<vmem>>, vector<32x128xbf16>,
    %c0_i32 = arith.constant 0 : i32
    %5 = arith.cmpi eq, %arg1, %c0_i32 : i32
    %6 = arith.extui %5 : i1 to i32
    %c0_i32_5 = arith.constant 0 : i32
    %7 = arith.cmpi ne, %6, %c0_i32_5 : i32
    scf.if %7 {
      %cst_15 = arith.constant 0.000000e+00 : f32
      %19 = vector.broadcast %cst_15 : f32 to vector<8x128xf32>
      %c0_16 = arith.constant 0 : index
      %c0_17 = arith.constant 0 : index
      %20 = vector.load %arg5[%c0_16, %c0_17] : memref<8x128xf32, #tpu.memory_space<vmem>>, vector<8x128xf32>
      tpu.vector_store %arg5[%c0_16, %c0_17], %19 {strides = array<i32>} : memref<8x128xf32, #tpu.memory_space<vmem>>, vector<8x128xf32>,
    } else {
    }
    %c0_6 = arith.constant 0 : index
    %c0_7 = arith.constant 0 : index
    %8 = vector.load %arg5[%c0_6, %c0_7] : memref<8x128xf32, #tpu.memory_space<vmem>>, vector<1x128xf32>
    %cst_8 = arith.constant dense<0.000000e+00> : vector<128xf32>
    %9 = vector.multi_reduction <add>, %2, %cst_8 [0] : vector<32x128xf32> to vector<128xf32>
    %10 = vector.shape_cast %9 : vector<128xf32> to vector<1x128xf32>
    %11 = arith.addf %8, %10 : vector<1x128xf32>
    %c0_9 = arith.constant 0 : index
    %c0_10 = arith.constant 0 : index
    %12 = vector.load %arg5[%c0_9, %c0_10] : memref<8x128xf32, #tpu.memory_space<vmem>>, vector<1x128xf32>
    tpu.vector_store %arg5[%c0_9, %c0_10], %11 {strides = array<i32>} : memref<8x128xf32, #tpu.memory_space<vmem>>, vector<1x128xf32>,
    %c1 = arith.constant 1 : index
    %c0_11 = arith.constant 0 : index
    %13 = vector.load %arg5[%c1, %c0_11] : memref<8x128xf32, #tpu.memory_space<vmem>>, vector<1x128xf32>
    %14 = arith.mulf %2, %2 : vector<32x128xf32>
    %cst_12 = arith.constant dense<0.000000e+00> : vector<128xf32>
    %15 = vector.multi_reduction <add>, %14, %cst_12 [0] : vector<32x128xf32> to vector<128xf32>
    %16 = vector.shape_cast %15 : vector<128xf32> to vector<1x128xf32>
    %17 = arith.addf %13, %16 : vector<1x128xf32>
    %c1_13 = arith.constant 1 : index
    %c0_14 = arith.constant 0 : index
    %18 = vector.load %arg5[%c1_13, %c0_14] : memref<8x128xf32, #tpu.memory_space<vmem>>, vector<1x128xf32>
    tpu.vector_store %arg5[%c1_13, %c0_14], %17 {strides = array<i32>} : memref<8x128xf32, #tpu.memory_space<vmem>>, vector<1x128xf32>,
    return
  }
  func.func @transform_0(%arg0: i32, %arg1: i32) -> (i32, i32) {
    %c1_i32 = arith.constant 1 : i32
    %0 = arith.muli %arg0, %c1_i32 : i32
    %1 = arith.addi %0, %arg1 : i32
    %c0_i32 = arith.constant 0 : i32
    %c0_i32_0 = arith.constant 0 : i32
    return %1, %c0_i32 : i32, i32
  }
  func.func @transform_1(%arg0: i32, %arg1: i32) -> (i32, i32) {
    %c0_i32 = arith.constant 0 : i32
    %c0_i32_0 = arith.constant 0 : i32
    %c0_i32_1 = arith.constant 0 : i32
    return %c0_i32, %c0_i32_0 : i32, i32
  }
  func.func @transform_2(%arg0: i32, %arg1: i32) -> (i32, i32) {
    %c1_i32 = arith.constant 1 : i32
    %0 = arith.muli %arg0, %c1_i32 : i32
    %1 = arith.addi %0, %arg1 : i32
    %c0_i32 = arith.constant 0 : i32
    %c0_i32_0 = arith.constant 0 : i32
    return %1, %c0_i32 : i32, i32
  }
  func.func @transform_3(%arg0: i32, %arg1: i32) -> (i32, i32) {
    %c0_i32 = arith.constant 0 : i32
    %c0_i32_0 = arith.constant 0 : i32
    return %arg0, %c0_i32 : i32, i32
  }
}

</mosaic_0001>

<bundles_post_ra>
// kernel: forward.15
= control target key start
LH: loop header
LB: loop body
LE: loop exit
PB: predicated region body
PF: predicated region fallthrough
CT: control target
= control target key end

     0   :  { %s327_s1 = inlined_call_operand.vmem [shape: f32[8,128], index: 1, kind: input, shape index: {}]   ;;  %s328_s0 = inlined_call_operand.vmem [shape: bf16[128,128], index: 0, kind: input, shape index: {}, may-alias: {0,3}]   ;;  %s329_s2 = inlined_call_operand.vmem [shape: f32[8,128], index: 2, kind: input, shape index: {}]   ;;  %s330_s3 = inlined_call_operand.vmem [shape: bf16[128,128], index: 3, kind: output, shape index: {}, may-alias: {0,3}]  }
   0x1   :  { %v14_v0 = vld [vmem:[%s327_s1] sm:$0x1]  ;;  %v15_v1 = vld [vmem:[%s327_s1 + $0x1] sm:$0x1]  ;;  %v227_v14 = vld [vmem:[%s328_s0 + $0x8] sm:$0xff]  }
   0x2   :  { %v16_v2 = vmul.f32 0.0078125, %v14_v0  ;;  %v17_v3 = vmul.f32 0.0078125, %v15_v1  ;;  %v156_v13 = vld [vmem:[%s328_s0] sm:$0xff]   ;;  %v228_v17 = vld [vmem:[%s328_s0 + $0x10] sm:$0xff]   ;;  %v229_v18 = vld [vmem:[%s328_s0 + $0x18] sm:$0xff]   ;;  %v161_v23 = vunpack.c.l.bf16 %v227_v14  ;;  %v162_v26 = vunpack.c.h.bf16 %v227_v14 }
   0x3   :  { %v21_v15 = vld [vmem:[%s329_s2] sm:$0x1]  ;;  %v157_v21 = vunpack.c.l.bf16 %v156_v13  ;;  %v158_v22 = vunpack.c.h.bf16 %v156_v13  ;;  %v231_v24 = vld [vmem:[%s328_s0 + $0x28] sm:$0xff]   ;;  %v165_v27 = vunpack.c.l.bf16 %v228_v17  ;;  %v166_v28 = vunpack.c.h.bf16 %v228_v17  ;;  %v232_v29 = vld [vmem:[%s328_s0 + $0x30] sm:$0xff]  }
   0x4   :  { %v18_v4 = vmul.f32 %v16_v2, %v16_v2  ;;  %v230_v19 = vld [vmem:[%s328_s0 + $0x20] sm:$0xff]   ;;  %v296_v30 = vld [vmem:[%s328_s0 + $0x38] sm:$0xff]   ;;  %v169_v32 = vunpack.c.l.bf16 %v229_v18  ;;  %v170_v33 = vunpack.c.h.bf16 %v229_v18  ;;  %v177_v38 = vunpack.c.l.bf16 %v231_v24 }
   0x5   :  { %v34_v31 = vld [vmem:[%s329_s2 + $0x1] sm:$0x1]  ;;  %v173_v34 = vunpack.c.l.bf16 %v230_v19  ;;  %v174_v35 = vunpack.c.h.bf16 %v230_v19  ;;  %v178_v39 = vunpack.c.h.bf16 %v231_v24  ;;  %v181_v40 = vunpack.c.l.bf16 %v232_v29 }
   0x6   :  { %v19_v5 = vsub.f32 %v17_v3, %v18_v4  ;;  %v182_v41 = vunpack.c.h.bf16 %v232_v29  ;;  %v185_v42 = vunpack.c.l.bf16 %v296_v30  ;;  %v186_v43 = vunpack.c.h.bf16 %v296_v30 }
   0x8   :  { %v20_v6 = vmax.f32 %v19_v5, 0.0 }
   0xa   :  { %v22_v7 = vadd.f32 1e-05, %v20_v6 }
   0xc   :  { %241 = vrsqrt.f32 %v22_v7  ;;  %vm29_vm0 = vweird.f32 %v22_v7 }
  0x12   :  { %v242_v8 = vpop.eup %241 }
  0x13   :  { %v24_v9 = vmul.f32 %v242_v8, %v22_v7  ;;  %vm30_vm1 = vweird.f32 %v242_v8 }
  0x14   :  { %vm31_vm2 = vmor %vm29_vm0, %vm30_vm1 }
  0x15   :  { %v25_v10 = vmul.f32 %v242_v8, %v24_v9 }
  0x17   :  { %v26_v11 = vmul.f32 0.5, %v25_v10 }
  0x19   :  { %v27_v12 = vsub.f32 1.5, %v26_v11 }
  0x1b   :  { %v28_v16 = vmul.f32 %v242_v8, %v27_v12 }
  0x1d   :  { %v32_v20 = vsel %vm31_vm2, %v242_v8, %v28_v16 }
  0x1e   :  { %v33_v25 = vmul.f32 %v32_v20, %v21_v15 }
  0x20   :  { %v35_v36 = vmul.f32 %v33_v25, %v16_v2  ;;  %v69_v37 = vperm.slane %v33_v25, 0 }
  0x22   :  { %v36_v44 = vsub.f32 %v34_v31, %v35_v36  ;;  %v70_v45 = vmul.f32 %v157_v21, %v69_v37  ;;  %v71_v46 = vmul.f32 %v158_v22, %v69_v37  ;;  %v72_v47 = vmul.f32 %v161_v23, %v69_v37 }
  0x23   :  { %v73_v48 = vmul.f32 %v162_v26, %v69_v37  ;;  %v74_v49 = vmul.f32 %v165_v27, %v69_v37  ;;  %v75_v50 = vmul.f32 %v166_v28, %v69_v37  ;;  %v76_v51 = vmul.f32 %v169_v32, %v69_v37 }
  0x24   :  { %v86_v52 = vperm.slane %v36_v44, 0  ;;  %v77_v53 = vmul.f32 %v170_v33, %v69_v37  ;;  %v78_v54 = vmul.f32 %v173_v34, %v69_v37  ;;  %v79_v55 = vmul.f32 %v174_v35, %v69_v37 }
  0x25   :  { %v80_v56 = vmul.f32 %v177_v38, %v69_v37  ;;  %v81_v57 = vmul.f32 %v178_v39, %v69_v37  ;;  %v82_v58 = vmul.f32 %v181_v40, %v69_v37  ;;  %v83_v59 = vmul.f32 %v182_v41, %v69_v37 }
  0x26   :  { %v87_v60 = vadd.f32 %v86_v52, %v70_v45  ;;  %v88_v61 = vadd.f32 %v86_v52, %v71_v46  ;;  %v89_v62 = vadd.f32 %v86_v52, %v72_v47  ;;  %v90_v63 = vadd.f32 %v86_v52, %v73_v48 }
  0x27   :  { %v91_v0 = vadd.f32 %v86_v52, %v74_v49  ;;  %v92_v1 = vadd.f32 %v86_v52, %v75_v50  ;;  %v93_v2 = vadd.f32 %v86_v52, %v76_v51  ;;  %v94_v3 = vadd.f32 %v86_v52, %v77_v53 }
  0x28   :  { %v103_v4 = vmax.f32 %v87_v60, 0.0  ;;  %v104_v5 = vmax.f32 %v88_v61, 0.0  ;;  %v105_v6 = vmax.f32 %v89_v62, 0.0  ;;  %v106_v7 = vmax.f32 %v90_v63, 0.0 }
  0x29   :  { %v107_v8 = vmax.f32 %v91_v0, 0.0  ;;  %v108_v9 = vmax.f32 %v92_v1, 0.0  ;;  %v109_v10 = vmax.f32 %v93_v2, 0.0  ;;  %v110_v11 = vmax.f32 %v94_v3, 0.0 }
  0x2a   :  { %v190_v12 = vpack.c.bf16 %v104_v5, %v103_v4  ;;  %v195_v13 = vpack.c.bf16 %v106_v7, %v105_v6  ;;  %v95_v14 = vadd.f32 %v86_v52, %v78_v54  ;;  %v96_v15 = vadd.f32 %v86_v52, %v79_v55 }
  0x2b   :  { %v200_v16 = vpack.c.bf16 %v108_v9, %v107_v8  ;;  %v205_v17 = vpack.c.bf16 %v110_v11, %v109_v10  ;;  %v97_v18 = vadd.f32 %v86_v52, %v80_v56  ;;  %v98_v19 = vadd.f32 %v86_v52, %v81_v57 }
  0x2c   :  { %191 = vst [vmem:[%s330_s3] sm:$0xff] %v190_v12   ;;  %v111_v20 = vmax.f32 %v95_v14, 0.0  ;;  %v112_v21 = vmax.f32 %v96_v15, 0.0  ;;  %v99_v22 = vadd.f32 %v86_v52, %v82_v58  ;;  %v100_v23 = vadd.f32 %v86_v52, %v83_v59 }
  0x2d   :  { %234 = vst [vmem:[%s330_s3 + $0x8] sm:$0xff] %v195_v13   ;;  %v113_v24 = vmax.f32 %v97_v18, 0.0  ;;  %v114_v25 = vmax.f32 %v98_v19, 0.0  ;;  %v84_v26 = vmul.f32 %v185_v42, %v69_v37  ;;  %v85_v27 = vmul.f32 %v186_v43, %v69_v37 }
  0x2e   :  { %235 = vst [vmem:[%s330_s3 + $0x10] sm:$0xff] %v200_v16   ;;  %v210_v28 = vpack.c.bf16 %v112_v21, %v111_v20  ;;  %v115_v29 = vmax.f32 %v99_v22, 0.0  ;;  %v116_v30 = vmax.f32 %v100_v23, 0.0 }
  0x2f   :  { %236 = vst [vmem:[%s330_s3 + $0x18] sm:$0xff] %v205_v17   ;;  %v215_v31 = vpack.c.bf16 %v114_v25, %v113_v24  ;;  %v101_v32 = vadd.f32 %v86_v52, %v84_v26  ;;  %v102_v33 = vadd.f32 %v86_v52, %v85_v27 }
  0x30   :  { %237 = vst [vmem:[%s330_s3 + $0x20] sm:$0xff] %v210_v28   ;;  %v220_v34 = vpack.c.bf16 %v116_v30, %v115_v29 }
  0x31   :  { %238 = vst [vmem:[%s330_s3 + $0x28] sm:$0xff] %v215_v31   ;;  %v117_v35 = vmax.f32 %v101_v32, 0.0  ;;  %v118_v36 = vmax.f32 %v102_v33, 0.0 }
  0x32   :  { %239 = vst [vmem:[%s330_s3 + $0x30] sm:$0xff] %v220_v34  }
  0x33   :  { %v225_v37 = vpack.c.bf16 %v118_v36, %v117_v35 }
  0x35   :  { %240 = vst [vmem:[%s330_s3 + $0x38] sm:$0xff] %v225_v37  }

// kernel: forward.14
= control target key start
LH: loop header
LB: loop body
LE: loop exit
PB: predicated region body
PF: predicated region fallthrough
CT: control target
= control target key end

     0   :  { %vm266_vm0 = vcmask 1041408   ;;  %vm241_vm1 = vcmask 556032   ;;  %s935_s1 = inlined_call_operand.vmem [shape: bf16[196,128], index: 1, kind: input, shape index: {}]   ;;  %s936_s0 = inlined_call_operand.vmem [shape: bf16[128,196], index: 0, kind: input, shape index: {}]   ;;  %s937_s2 = inlined_call_operand.vmem [shape: bf16[128,128], index: 2, kind: output, shape index: {0}]   ;;  %s938_s3 = inlined_call_operand.vmem [shape: f32[8,128], index: 3, kind: output, shape index: {1}]  }
   0x1   :  { %v648_v0 = vld [vmem:[%s935_s1 + $0x38] sm:$0xff]  ;;  %v93_v1 = vld [vmem:[%s935_s1 + $0x60] sm:$0x3]  ;;  %v647_v3 = vld [vmem:[%s935_s1 + $0x30] sm:$0xff] }
   0x2   :  { %v215_v2 = vunpack.c.l.b16 %v93_v1  ;;  %270 = vmatpush.bf16.msra.mxu0 %v648_v0  ;;  %700 = vmatpush.bf16.msra.mxu2 %v648_v0  ;;  %v652_v6 = vld [vmem:[%s935_s1 + $0x58] sm:$0xff]  ;;  %v646_v7 = vld [vmem:[%s935_s1 + $0x28] sm:$0xff]  ;;  %v651_v8 = vld [vmem:[%s935_s1 + $0x50] sm:$0xff] }
   0x3   :  { %v645_v9 = vld [vmem:[%s935_s1 + $0x20] sm:$0xff]  ;;  %v650_v10 = vld [vmem:[%s935_s1 + $0x48] sm:$0xff]  ;;  %v644_v11 = vld [vmem:[%s935_s1 + $0x18] sm:$0xff] }
   0x4   :  { %v228_v4 = vpack.c.b16 %v215_v2, %v215_v2  ;;  %v649_v12 = vld [vmem:[%s935_s1 + $0x40] sm:$0xff]  ;;  %v643_v13 = vld [vmem:[%s935_s1 + $0x10] sm:$0xff]  ;;  %v509_v15 = vld [vmem:[%s936_s0 + $0x8] sm:$0xf0] }
   0x5   :  { %v625_v14 = vld [vmem:[%s936_s0 + $0x4] sm:$0xf]  ;;  %v635_v16 = vld [vmem:[%s936_s0 + $0x54] sm:$0xf]  ;;  %v549_v17 = vld [vmem:[%s936_s0 + $0x58] sm:$0xf0] }
   0x6   :  { %v268_v5 = vsel %vm266_vm0, %v228_v4, 0  ;;  %271 = vmatpush.bf16.msra.mxu0 %v647_v3  ;;  %701 = vmatpush.bf16.msra.mxu2 %v647_v3  ;;  %v512_v18 = vor.u32 %v625_v14, %v509_v15  ;;  %v642_v19 = vld [vmem:[%s935_s1 + $0x8] sm:$0xff]  ;;  %v552_v20 = vor.u32 %v635_v16, %v549_v17  ;;  %v641_v21 = vld [vmem:[%s935_s1] sm:$0xff]  ;;  %v627_v28 = vld [vmem:[%s936_s0 + $0x14] sm:$0xf] }
   0x7   :  { %322 = vmatpush.bf16.msra.mxu1 %v268_v5  ;;  %708 = vmatpush.bf16.msra.mxu3 %v268_v5  ;;  %v507_v22 = vld [vmem:[%s936_s0] sm:$0xf]  ;;  %v626_v23 = vld [vmem:[%s936_s0 + $0x4] sm:$0xf0]  ;;  %v517_v29 = vld [vmem:[%s936_s0 + $0x18] sm:$0xf0] }
   0x8   :  { %v539_v24 = vld [vmem:[%s936_s0 + $0x40] sm:$0xf]  ;;  %v634_v25 = vld [vmem:[%s936_s0 + $0x44] sm:$0xf0]  ;;  %v508_v26 = vor.u32 %v626_v23, %v507_v22  ;;  %v637_v30 = vld [vmem:[%s936_s0 + $0x64] sm:$0xf]  ;;  %v520_v32 = vor.u32 %v627_v28, %v517_v29 }
   0x9   :  { %v540_v27 = vor.u32 %v634_v25, %v539_v24  ;;  %v557_v31 = vld [vmem:[%s936_s0 + $0x68] sm:$0xf0]  ;;  %v515_v34 = vld [vmem:[%s936_s0 + $0x10] sm:$0xf]  ;;  %v628_v35 = vld [vmem:[%s936_s0 + $0x14] sm:$0xf0] }
   0xa   :  { %272 = vmatpush.bf16.msra.mxu0 %v646_v7  ;;  %702 = vmatpush.bf16.msra.mxu2 %v646_v7  ;;  %v560_v33 = vor.u32 %v637_v30, %v557_v31  ;;  %v547_v36 = vld [vmem:[%s936_s0 + $0x50] sm:$0xf]  ;;  %v636_v37 = vld [vmem:[%s936_s0 + $0x54] sm:$0xf0]  ;;  %v516_v38 = vor.u32 %v628_v35, %v515_v34  ;;  %v629_v40 = vld [vmem:[%s936_s0 + $0x24] sm:$0xf] }
   0xb   :  { %323 = vmatpush.bf16.msra.mxu1 %v652_v6  ;;  %709 = vmatpush.bf16.msra.mxu3 %v652_v6  ;;  %v548_v39 = vor.u32 %v636_v37, %v547_v36  ;;  %v525_v41 = vld [vmem:[%s936_s0 + $0x28] sm:$0xf0]  ;;  %v639_v42 = vld [vmem:[%s936_s0 + $0x74] sm:$0xf]  ;;  %v565_v43 = vld [vmem:[%s936_s0 + $0x78] sm:$0xf0] }
   0xc   :  { %v528_v44 = vor.u32 %v629_v40, %v525_v41  ;;  %v568_v45 = vor.u32 %v639_v42, %v565_v43  ;;  %v523_v46 = vld [vmem:[%s936_s0 + $0x20] sm:$0xf]  ;;  %v630_v47 = vld [vmem:[%s936_s0 + $0x24] sm:$0xf0]  ;;  %v631_v52 = vld [vmem:[%s936_s0 + $0x34] sm:$0xf] }
   0xd   :  { %v555_v48 = vld [vmem:[%s936_s0 + $0x60] sm:$0xf]  ;;  %v638_v49 = vld [vmem:[%s936_s0 + $0x64] sm:$0xf0]  ;;  %v524_v50 = vor.u32 %v630_v47, %v523_v46  ;;  %v533_v53 = vld [vmem:[%s936_s0 + $0x38] sm:$0xf0] }
   0xe   :  { %273 = vmatpush.bf16.msra.mxu0 %v645_v9  ;;  %703 = vmatpush.bf16.msra.mxu2 %v645_v9  ;;  %v556_v51 = vor.u32 %v638_v49, %v555_v48  ;;  %v536_v54 = vor.u32 %v631_v52, %v533_v53  ;;  %v531_v55 = vld [vmem:[%s936_s0 + $0x30] sm:$0xf]  ;;  %v632_v56 = vld [vmem:[%s936_s0 + $0x34] sm:$0xf0]  ;;  %v633_v61 = vld [vmem:[%s936_s0 + $0x44] sm:$0xf] }
   0xf   :  { %324 = vmatpush.bf16.msra.mxu1 %v651_v8  ;;  %710 = vmatpush.bf16.msra.mxu3 %v651_v8  ;;  %v563_v57 = vld [vmem:[%s936_s0 + $0x70] sm:$0xf]  ;;  %v640_v58 = vld [vmem:[%s936_s0 + $0x74] sm:$0xf0]  ;;  %v532_v59 = vor.u32 %v632_v56, %v531_v55  ;;  %v541_v62 = vld [vmem:[%s936_s0 + $0x48] sm:$0xf0] }
  0x10   :  { %v564_v60 = vor.u32 %v640_v58, %v563_v57  ;;  %v544_v63 = vor.u32 %v633_v61, %v541_v62 }
  0x12   :  { %274 = vmatpush.bf16.msra.mxu0 %v644_v11  ;;  %704 = vmatpush.bf16.msra.mxu2 %v644_v11 }
  0x13   :  { %325 = vmatpush.bf16.msra.mxu1 %v650_v10  ;;  %711 = vmatpush.bf16.msra.mxu3 %v650_v10 }
  0x16   :  { %275 = vmatpush.bf16.msra.mxu0 %v643_v13  ;;  %705 = vmatpush.bf16.msra.mxu2 %v643_v13 }
  0x17   :  { %326 = vmatpush.bf16.msra.mxu1 %v649_v12  ;;  %712 = vmatpush.bf16.msra.mxu3 %v649_v12 }
  0x1a   :  { %617 = vmatmul.msk.bf16.vlgmr.msra.gmra.mxu1 %vm241_vm1, %v512_v18  ;;  %276 = vmatpush.bf16.msra.mxu0 %v642_v19 }
  0x1b   :  { %622 = vmatmul.msk.bf16.vlgmr.msra.gmra.mxu3 %vm241_vm1, %v552_v20  ;;  %706 = vmatpush.bf16.msra.mxu2 %v642_v19 }
  0x1e   :  { %277 = vmatpush.bf16.msra.mxu0 %v641_v21 }
  0x1f   :  { %707 = vmatpush.bf16.msra.mxu2 %v641_v21 }
  0x21   :  { %278 = vmatmul.bf16.vlgmr.msra.gmra.mxu0 %v508_v26 }
  0x22   :  { %298 = vmatmul.bf16.vlgmr.msra.gmra.mxu2 %v540_v27 }
  0x2a   :  { %618 = vmatmul.msk.bf16.gmra.mxu1 %vm241_vm1, %v520_v32 }
  0x2b   :  { %623 = vmatmul.msk.bf16.gmra.mxu3 %vm241_vm1, %v560_v33  ;;  %v714_v33 = vmov 0.0  }
  0x2c   :  { %404 = vst [vmem:[%s938_s3] sm:$0xff] %v714_v33 }
  0x31   :  { %283 = vmatmul.bf16.gmra.mxu0 %v516_v38 }
  0x32   :  { %303 = vmatmul.bf16.gmra.mxu2 %v548_v39 }
  0x3a   :  { %619 = vmatmul.msk.bf16.gmra.mxu1 %vm241_vm1, %v528_v44 }
  0x3b   :  { %624 = vmatmul.msk.bf16.gmra.mxu3 %vm241_vm1, %v568_v45 }
  0x41   :  { %288 = vmatmul.bf16.gmra.mxu0 %v524_v50 }
  0x42   :  { %308 = vmatmul.bf16.gmra.mxu2 %v556_v51 }
  0x4a   :  { %620 = vmatmul.msk.bf16.gmra.mxu1 %vm241_vm1, %v536_v54 }
  0x51   :  { %293 = vmatmul.bf16.gmra.mxu0 %v532_v59 }
  0x52   :  { %313 = vmatmul.bf16.gmra.mxu2 %v564_v60 }
  0x5a   :  { %621 = vmatmul.msk.bf16.gmra.mxu1 %vm241_vm1, %v544_v63 }
  0x97   :  { %v328_v0 = vpop.f32.mrf.mxu1 }
  0x9e   :  { %v279_v2 = vpop.f32.mrf.mxu0  ;;  %v353_v9 = vpop.f32.mrf.mxu3 }
  0x9f   :  { %v330_v1 = vpop.f32.mrf.mxu1  ;;  %v329_v6 = vadd.f32 %v328_v0, %v279_v2 }
  0xa1   :  { %v430_v41 = vmul.f32 %v329_v6, %v329_v6 }
  0xa5   :  { %v878_v3 = vpop.f32.mrf.mxu2 }
  0xa6   :  { %v281_v5 = vpop.f32.mrf.mxu0  ;;  %v355_v13 = vpop.f32.mrf.mxu3 }
  0xa7   :  { %v333_v4 = vpop.f32.mrf.mxu1  ;;  %v331_v7 = vadd.f32 %v330_v1, %v281_v5 }
  0xa9   :  { %v656_v8 = vpack.c.bf16 %v331_v7, %v329_v6  ;;  %v431_v36 = vmul.f32 %v331_v7, %v331_v7  ;;  %v406_v42 = vadd.f32 %v331_v7, %v329_v6 }
  0xab   :  { %657 = vst [vmem:[%s937_s2] sm:$0xff] %v656_v8   ;;  %v446_v45 = vadd.f32 %v431_v36, %v430_v41 }
  0xad   :  { %v883_v10 = vpop.f32.mrf.mxu2 }
  0xae   :  { %v284_v12 = vpop.f32.mrf.mxu0  ;;  %v358_v22 = vpop.f32.mrf.mxu3 }
  0xaf   :  { %v335_v11 = vpop.f32.mrf.mxu1  ;;  %v334_v17 = vadd.f32 %v333_v4, %v284_v12 }
  0xb1   :  { %v432_v43 = vmul.f32 %v334_v17, %v334_v17  ;;  %v407_v46 = vadd.f32 %v406_v42, %v334_v17 }
  0xb3   :  { %v447_v49 = vadd.f32 %v446_v45, %v432_v43 }
  0xb5   :  { %v304_v14 = vpop.f32.mrf.mxu2 }
  0xb6   :  { %v286_v16 = vpop.f32.mrf.mxu0  ;;  %v888_v20 = vadd.f32 %v353_v9, %v304_v14  ;;  %v360_v32 = vpop.f32.mrf.mxu3 }
  0xb7   :  { %v338_v15 = vpop.f32.mrf.mxu1  ;;  %v336_v18 = vadd.f32 %v335_v11, %v286_v16 }
  0xb9   :  { %v661_v19 = vpack.c.bf16 %v336_v18, %v334_v17  ;;  %v433_v47 = vmul.f32 %v336_v18, %v336_v18  ;;  %v408_v50 = vadd.f32 %v407_v46, %v336_v18 }
  0xbb   :  { %693 = vst [vmem:[%s937_s2 + $0x8] sm:$0xff] %v661_v19   ;;  %v448_v53 = vadd.f32 %v447_v49, %v433_v47 }
  0xbd   :  { %v306_v21 = vpop.f32.mrf.mxu2 }
  0xbe   :  { %v289_v24 = vpop.f32.mrf.mxu0  ;;  %v890_v25 = vadd.f32 %v355_v13, %v306_v21  ;;  %v363_v48 = vpop.f32.mrf.mxu3 }
  0xbf   :  { %v340_v23 = vpop.f32.mrf.mxu1  ;;  %v339_v30 = vadd.f32 %v338_v15, %v289_v24 }
  0xc0   :  { %v681_v26 = vpack.c.bf16 %v890_v25, %v888_v20  ;;  %v441_v24 = vmul.f32 %v890_v25, %v890_v25 }
  0xc1   :  { %v434_v51 = vmul.f32 %v339_v30, %v339_v30  ;;  %v409_v54 = vadd.f32 %v408_v50, %v339_v30 }
  0xc2   :  { %697 = vst [vmem:[%s937_s2 + $0x28] sm:$0xff] %v681_v26  }
  0xc3   :  { %v449_v59 = vadd.f32 %v448_v53, %v434_v51  ;;  %v429_v51 = vld [vmem:[%s938_s3 + $0x1] sm:$0x1] }
  0xc5   :  { %v309_v27 = vpop.f32.mrf.mxu2 }
  0xc6   :  { %v291_v29 = vpop.f32.mrf.mxu0  ;;  %v359_v35 = vadd.f32 %v358_v22, %v309_v27  ;;  %v365_v7 = vpop.f32.mrf.mxu3  ;;  %v440_v22 = vmul.f32 %v888_v20, %v888_v20 }
  0xc7   :  { %v343_v28 = vpop.f32.mrf.mxu1  ;;  %v341_v31 = vadd.f32 %v340_v23, %v291_v29 }
  0xc9   :  { %v666_v34 = vpack.c.bf16 %v341_v31, %v339_v30  ;;  %v435_v55 = vmul.f32 %v341_v31, %v341_v31  ;;  %v410_v60 = vadd.f32 %v409_v54, %v341_v31 }
  0xcb   :  { %694 = vst [vmem:[%s937_s2 + $0x10] sm:$0xff] %v666_v34   ;;  %v450_v63 = vadd.f32 %v449_v59, %v435_v55 }
  0xcd   :  { %v311_v37 = vpop.f32.mrf.mxu2 }
  0xce   :  { %v294_v39 = vpop.f32.mrf.mxu0  ;;  %v361_v40 = vadd.f32 %v360_v32, %v311_v37 }
  0xcf   :  { %v345_v38 = vpop.f32.mrf.mxu1  ;;  %v344_v52 = vadd.f32 %v343_v28, %v294_v39  ;;  %v442_v28 = vmul.f32 %v359_v35, %v359_v35 }
  0xd0   :  { %v686_v44 = vpack.c.bf16 %v361_v40, %v359_v35  ;;  %v443_v31 = vmul.f32 %v361_v40, %v361_v40 }
  0xd1   :  { %v436_v61 = vmul.f32 %v344_v52, %v344_v52  ;;  %v411_v0 = vadd.f32 %v410_v60, %v344_v52 }
  0xd2   :  { %698 = vst [vmem:[%s937_s2 + $0x30] sm:$0xff] %v686_v44  }
  0xd3   :  { %v451_v4 = vadd.f32 %v450_v63, %v436_v61 }
  0xd5   :  { %v314_v56 = vpop.f32.mrf.mxu2 }
  0xd6   :  { %v296_v58 = vpop.f32.mrf.mxu0  ;;  %v364_v8 = vadd.f32 %v363_v48, %v314_v56 }
  0xd7   :  { %v348_v57 = vpop.f32.mrf.mxu1  ;;  %v346_v62 = vadd.f32 %v345_v38, %v296_v58 }
  0xd8   :  { %v349_v5 = vadd.f32 %v348_v57, %v878_v3  ;;  %v444_v34 = vmul.f32 %v364_v8, %v364_v8 }
  0xd9   :  { %v671_v1 = vpack.c.bf16 %v346_v62, %v344_v52  ;;  %v437_v2 = vmul.f32 %v346_v62, %v346_v62  ;;  %v412_v6 = vadd.f32 %v411_v0, %v346_v62 }
  0xda   :  { %v438_v14 = vmul.f32 %v349_v5, %v349_v5 }
  0xdb   :  { %695 = vst [vmem:[%s937_s2 + $0x18] sm:$0xff] %v671_v1   ;;  %v452_v9 = vadd.f32 %v451_v4, %v437_v2  ;;  %v413_v16 = vadd.f32 %v412_v6, %v349_v5 }
  0xdd   :  { %v316_v11 = vpop.f32.mrf.mxu2  ;;  %v453_v3 = vadd.f32 %v452_v9, %v438_v14 }
  0xde   :  { %v366_v13 = vadd.f32 %v365_v7, %v316_v11 }
  0xdf   :  { %v350_v12 = vpop.f32.mrf.mxu1 }
  0xe0   :  { %v351_v15 = vadd.f32 %v350_v12, %v883_v10  ;;  %v691_v17 = vpack.c.bf16 %v366_v13, %v364_v8  ;;  %v445_v39 = vmul.f32 %v366_v13, %v366_v13 }
  0xe2   :  { %v676_v18 = vpack.c.bf16 %v351_v15, %v349_v5  ;;  %v414_v19 = vadd.f32 %v413_v16, %v351_v15  ;;  %v439_v21 = vmul.f32 %v351_v15, %v351_v15  ;;  %699 = vst [vmem:[%s937_s2 + $0x38] sm:$0xff] %v691_v17  }
  0xe4   :  { %696 = vst [vmem:[%s937_s2 + $0x20] sm:$0xff] %v676_v18   ;;  %v415_v23 = vadd.f32 %v414_v19, %v888_v20  ;;  %v454_v10 = vadd.f32 %v453_v3, %v439_v21 }
  0xe6   :  { %v416_v26 = vadd.f32 %v415_v23, %v890_v25  ;;  %v455_v27 = vadd.f32 %v454_v10, %v440_v22 }
  0xe8   :  { %v456_v29 = vadd.f32 %v455_v27, %v441_v24  ;;  %v417_v30 = vadd.f32 %v416_v26, %v359_v35  ;;  %v405_v35 = vld [vmem:[%s938_s3] sm:$0x1] }
  0xea   :  { %v418_v32 = vadd.f32 %v417_v30, %v361_v40  ;;  %v457_v33 = vadd.f32 %v456_v29, %v442_v28 }
  0xec   :  { %v419_v36 = vadd.f32 %v418_v32, %v364_v8  ;;  %v458_v37 = vadd.f32 %v457_v33, %v443_v31 }
  0xee   :  { %v420_v38 = vadd.f32 %v419_v36, %v366_v13  ;;  %v459_v41 = vadd.f32 %v458_v37, %v444_v34 }
  0xf0   :  { %v421_v20 = vrot.slane %v420_v38, 4  ;;  %v460_v42 = vadd.f32 %v459_v41, %v445_v39 }
  0xf2   :  { %v422_v43 = vadd.f32 %v421_v20, %v420_v38  ;;  %v461_v44 = vrot.slane %v460_v42, 4 }
  0xf4   :  { %v423_v45 = vrot.slane %v422_v43, 2  ;;  %v462_v46 = vadd.f32 %v461_v44, %v460_v42 }
  0xf6   :  { %v424_v25 = vadd.f32 %v423_v45, %v422_v43  ;;  %v463_v47 = vrot.slane %v462_v46, 2 }
  0xf8   :  { %v425_v48 = vrot.slane %v424_v25, 1  ;;  %v464_v49 = vadd.f32 %v463_v47, %v462_v46 }
  0xfa   :  { %v426_v40 = vadd.f32 %v425_v48, %v424_v25  ;;  %v465_v50 = vrot.slane %v464_v49, 1 }
  0xfc   :  { %v427_v52 = vadd.f32 %v426_v40, %v405_v35  ;;  %v466_v53 = vadd.f32 %v465_v50, %v464_v49 }
  0xfe   :  { %428 = vst [vmem:[%s938_s3] sm:$0x1] %v427_v52  ;;  %v467_v54 = vadd.f32 %v466_v53, %v429_v51 }
 0x100   :  { %468 = vst [vmem:[%s938_s3 + $0x1] sm:$0x1] %v467_v54 }

// kernel: forward.16
= control target key start
LH: loop header
LB: loop body
LE: loop exit
PB: predicated region body
PF: predicated region fallthrough
CT: control target
= control target key end

     0   :  { %vm72_vm0 = vcmask 1043456   ;;  %vm65_vm1 = vcmask 64512   ;;  %v197_v4 = vmov 0.0   ;;  %s248_s1 = inlined_call_operand.vmem [shape: bf16[8,128], index: 1, kind: input, shape index: {}]   ;;  %s249_s0 = inlined_call_operand.vmem [shape: bf16[32,8], index: 0, kind: input, shape index: {}]   ;;  %s250_s3 = inlined_call_operand.vmem [shape: f32[8,128], index: 3, kind: output, shape index: {1}]   ;;  %s251_s2 = inlined_call_operand.vmem [shape: bf16[32,128], index: 2, kind: output, shape index: {0}]  }
   0x1   :  { %v54_v0 = vld [vmem:[%s248_s1] sm:$0xf]  ;;  %v183_v3 = vld [vmem:[%s249_s0 + $0x8] sm:$0xff]  ;;  %107 = vst [vmem:[%s250_s3] sm:$0xff] %v197_v4 }
   0x2   :  { %v74_v1 = vsel %vm72_vm0, %v54_v0, 0  ;;  %v182_v2 = vld [vmem:[%s249_s0] sm:$0xff] }
   0x3   :  { %83 = vmatpush.bf16.msra.mxu0 %v74_v1  ;;  %195 = vmatpush.bf16.msra.mxu1 %v74_v1 }
   0x6   :  { %180 = vmatmul.msk.bf16.vlgmr.msra.gmra.mxu0 %vm65_vm1, %v182_v2  ;;  %181 = vmatmul.msk.bf16.vlgmr.msra.gmra.mxu1 %vm65_vm1, %v183_v3 }
   0x8   :  { %v108_v30 = vld [vmem:[%s250_s3] sm:$0x1]  ;;  %v120_v33 = vld [vmem:[%s250_s3 + $0x1] sm:$0x1] }
  0x83   :  { %v85_v5 = vpop.f32.mrf.mxu0  ;;  %v90_v6 = vpop.f32.mrf.mxu1 }
  0x84   :  { %v121_v7 = vmul.f32 %v85_v5, %v85_v5  ;;  %v123_v14 = vmul.f32 %v90_v6, %v90_v6 }
  0x8b   :  { %v87_v8 = vpop.f32.mrf.mxu0  ;;  %v92_v9 = vpop.f32.mrf.mxu1 }
  0x8c   :  { %v187_v10 = vpack.c.bf16 %v87_v8, %v85_v5  ;;  %v109_v11 = vadd.f32 %v87_v8, %v85_v5  ;;  %v122_v12 = vmul.f32 %v87_v8, %v87_v8  ;;  %v192_v13 = vpack.c.bf16 %v92_v9, %v90_v6 }
  0x8d   :  { %v124_v18 = vmul.f32 %v92_v9, %v92_v9 }
  0x8e   :  { %188 = vst [vmem:[%s251_s2] sm:$0xff] %v187_v10   ;;  %v125_v15 = vadd.f32 %v122_v12, %v121_v7  ;;  %v110_v16 = vadd.f32 %v109_v11, %v90_v6 }
  0x8f   :  { %194 = vst [vmem:[%s251_s2 + $0x8] sm:$0xff] %v192_v13  }
  0x90   :  { %v111_v17 = vadd.f32 %v110_v16, %v92_v9  ;;  %v126_v19 = vadd.f32 %v125_v15, %v123_v14 }
  0x92   :  { %v112_v20 = vrot.slane %v111_v17, 4  ;;  %v127_v21 = vadd.f32 %v126_v19, %v124_v18 }
  0x94   :  { %v113_v22 = vadd.f32 %v112_v20, %v111_v17  ;;  %v128_v23 = vrot.slane %v127_v21, 4 }
  0x96   :  { %v114_v24 = vrot.slane %v113_v22, 2  ;;  %v129_v25 = vadd.f32 %v128_v23, %v127_v21 }
  0x98   :  { %v115_v26 = vadd.f32 %v114_v24, %v113_v22  ;;  %v130_v27 = vrot.slane %v129_v25, 2 }
  0x9a   :  { %v116_v28 = vrot.slane %v115_v26, 1  ;;  %v131_v29 = vadd.f32 %v130_v27, %v129_v25 }
  0x9c   :  { %v117_v31 = vadd.f32 %v116_v28, %v115_v26  ;;  %v132_v32 = vrot.slane %v131_v29, 1 }
  0x9e   :  { %v118_v34 = vadd.f32 %v117_v31, %v108_v30  ;;  %v133_v35 = vadd.f32 %v132_v32, %v131_v29 }
  0xa0   :  { %119 = vst [vmem:[%s250_s3] sm:$0x1] %v118_v34  ;;  %v134_v36 = vadd.f32 %v133_v35, %v120_v33 }
  0xa2   :  { %135 = vst [vmem:[%s250_s3 + $0x1] sm:$0x1] %v134_v36 }

// kernel: forward.17
= control target key start
LH: loop header
LB: loop body
LE: loop exit
PB: predicated region body
PF: predicated region fallthrough
CT: control target
= control target key end

     0   :  { %s133_s1 = inlined_call_operand.vmem [shape: f32[8,128], index: 1, kind: input, shape index: {}]   ;;  %s134_s0 = inlined_call_operand.vmem [shape: bf16[32,128], index: 0, kind: input, shape index: {}, may-alias: {0,3}]   ;;  %s135_s2 = inlined_call_operand.vmem [shape: f32[8,128], index: 2, kind: input, shape index: {}]   ;;  %s136_s3 = inlined_call_operand.vmem [shape: bf16[32,128], index: 3, kind: output, shape index: {}, may-alias: {0,3}]  }
   0x1   :  { %v14_v0 = vld [vmem:[%s133_s1] sm:$0x1]  ;;  %v15_v1 = vld [vmem:[%s133_s1 + $0x1] sm:$0x1]  ;;  %v85_v16 = vld [vmem:[%s134_s0 + $0x8] sm:$0xff]  }
   0x2   :  { %v16_v2 = vmul.f32 0.03125, %v14_v0  ;;  %v17_v3 = vmul.f32 0.03125, %v15_v1  ;;  %v21_v13 = vld [vmem:[%s135_s2] sm:$0x1]  ;;  %v73_v21 = vunpack.c.l.bf16 %v85_v16  ;;  %v34_v22 = vld [vmem:[%s135_s2 + $0x1] sm:$0x1]  ;;  %v74_v23 = vunpack.c.h.bf16 %v85_v16 }
   0x3   :  { %v68_v15 = vld [vmem:[%s134_s0] sm:$0xff]  }
   0x4   :  { %v18_v4 = vmul.f32 %v16_v2, %v16_v2  ;;  %v69_v19 = vunpack.c.l.bf16 %v68_v15  ;;  %v70_v20 = vunpack.c.h.bf16 %v68_v15 }
   0x6   :  { %v19_v5 = vsub.f32 %v17_v3, %v18_v4 }
   0x8   :  { %v20_v6 = vmax.f32 %v19_v5, 0.0 }
   0xa   :  { %v22_v7 = vadd.f32 1e-05, %v20_v6 }
   0xc   :  { %87 = vrsqrt.f32 %v22_v7  ;;  %vm29_vm0 = vweird.f32 %v22_v7 }
  0x12   :  { %v88_v8 = vpop.eup %87 }
  0x13   :  { %v24_v9 = vmul.f32 %v88_v8, %v22_v7  ;;  %vm30_vm1 = vweird.f32 %v88_v8 }
  0x14   :  { %vm31_vm2 = vmor %vm29_vm0, %vm30_vm1 }
  0x15   :  { %v25_v10 = vmul.f32 %v88_v8, %v24_v9 }
  0x17   :  { %v26_v11 = vmul.f32 0.5, %v25_v10 }
  0x19   :  { %v27_v12 = vsub.f32 1.5, %v26_v11 }
  0x1b   :  { %v28_v14 = vmul.f32 %v88_v8, %v27_v12 }
  0x1d   :  { %v32_v17 = vsel %vm31_vm2, %v88_v8, %v28_v14 }
  0x1e   :  { %v33_v18 = vmul.f32 %v32_v17, %v21_v13 }
  0x20   :  { %v35_v24 = vmul.f32 %v33_v18, %v16_v2  ;;  %v45_v25 = vperm.slane %v33_v18, 0 }
  0x22   :  { %v36_v26 = vsub.f32 %v34_v22, %v35_v24  ;;  %v46_v27 = vmul.f32 %v69_v19, %v45_v25  ;;  %v47_v28 = vmul.f32 %v70_v20, %v45_v25  ;;  %v48_v29 = vmul.f32 %v73_v21, %v45_v25 }
  0x23   :  { %v49_v30 = vmul.f32 %v74_v23, %v45_v25 }
  0x24   :  { %v50_v31 = vperm.slane %v36_v26, 0 }
  0x26   :  { %v51_v32 = vadd.f32 %v50_v31, %v46_v27  ;;  %v52_v33 = vadd.f32 %v50_v31, %v47_v28  ;;  %v53_v34 = vadd.f32 %v50_v31, %v48_v29  ;;  %v54_v35 = vadd.f32 %v50_v31, %v49_v30 }
  0x28   :  { %v78_v36 = vpack.c.bf16 %v52_v33, %v51_v32  ;;  %v83_v37 = vpack.c.bf16 %v54_v35, %v53_v34 }
  0x2a   :  { %79 = vst [vmem:[%s136_s3] sm:$0xff] %v78_v36  }
  0x2b   :  { %86 = vst [vmem:[%s136_s3 + $0x8] sm:$0xff] %v83_v37  }

// kernel: forward.18
= control target key start
LH: loop header
LB: loop body
LE: loop exit
PB: predicated region body
PF: predicated region fallthrough
CT: control target
= control target key end

     0   :  { %vm107_vm0 = vcmask 1043456   ;;  %vm100_vm1 = vcmask 588800   ;;  %v256_v10 = vmov 0.0   ;;  %s319_s1 = inlined_call_operand.vmem [shape: bf16[72,128], index: 1, kind: input, shape index: {}]   ;;  %s320_s0 = inlined_call_operand.vmem [shape: bf16[32,72], index: 0, kind: input, shape index: {}]   ;;  %s321_s3 = inlined_call_operand.vmem [shape: f32[8,128], index: 3, kind: output, shape index: {1}]   ;;  %s322_s2 = inlined_call_operand.vmem [shape: bf16[32,128], index: 2, kind: output, shape index: {0}]  }
   0x1   :  { %v62_v0 = vld [vmem:[%s319_s1 + $0x20] sm:$0xf]  ;;  %v238_v4 = vld [vmem:[%s319_s1 + $0x18] sm:$0xff]  ;;  %v237_v5 = vld [vmem:[%s319_s1 + $0x10] sm:$0xff]  ;;  %142 = vst [vmem:[%s321_s3] sm:$0xff] %v256_v10 }
   0x2   :  { %v90_v1 = vunpack.c.l.b16 %v62_v0  ;;  %v236_v6 = vld [vmem:[%s319_s1 + $0x8] sm:$0xff]  ;;  %v235_v7 = vld [vmem:[%s319_s1] sm:$0xff] }
   0x3   :  { %v233_v8 = vld [vmem:[%s320_s0] sm:$0xff]  ;;  %v234_v9 = vld [vmem:[%s320_s0 + $0x8] sm:$0xff] }
   0x4   :  { %v95_v2 = vpack.c.b16 %v90_v1, %v90_v1 }
   0x6   :  { %v109_v3 = vsel %vm107_vm0, %v95_v2, 0 }
   0x7   :  { %114 = vmatpush.bf16.msra.mxu0 %v109_v3  ;;  %250 = vmatpush.bf16.msra.mxu1 %v109_v3 }
   0x8   :  { %v143_v36 = vld [vmem:[%s321_s3] sm:$0x1]  ;;  %v155_v39 = vld [vmem:[%s321_s3 + $0x1] sm:$0x1] }
   0xb   :  { %115 = vmatpush.bf16.msra.mxu0 %v238_v4  ;;  %251 = vmatpush.bf16.msra.mxu1 %v238_v4 }
   0xf   :  { %116 = vmatpush.bf16.msra.mxu0 %v237_v5  ;;  %252 = vmatpush.bf16.msra.mxu1 %v237_v5 }
  0x13   :  { %117 = vmatpush.bf16.msra.mxu0 %v236_v6  ;;  %253 = vmatpush.bf16.msra.mxu1 %v236_v6 }
  0x17   :  { %118 = vmatpush.bf16.msra.mxu0 %v235_v7  ;;  %254 = vmatpush.bf16.msra.mxu1 %v235_v7 }
  0x1a   :  { %231 = vmatmul.msk.bf16.vlgmr.msra.gmra.mxu0 %vm100_vm1, %v233_v8  ;;  %232 = vmatmul.msk.bf16.vlgmr.msra.gmra.mxu1 %vm100_vm1, %v234_v9 }
  0x97   :  { %v120_v11 = vpop.f32.mrf.mxu0  ;;  %v125_v12 = vpop.f32.mrf.mxu1 }
  0x98   :  { %v156_v13 = vmul.f32 %v120_v11, %v120_v11  ;;  %v158_v20 = vmul.f32 %v125_v12, %v125_v12 }
  0x9f   :  { %v122_v14 = vpop.f32.mrf.mxu0  ;;  %v127_v15 = vpop.f32.mrf.mxu1 }
  0xa0   :  { %v242_v16 = vpack.c.bf16 %v122_v14, %v120_v11  ;;  %v144_v17 = vadd.f32 %v122_v14, %v120_v11  ;;  %v157_v18 = vmul.f32 %v122_v14, %v122_v14  ;;  %v247_v19 = vpack.c.bf16 %v127_v15, %v125_v12 }
  0xa1   :  { %v159_v24 = vmul.f32 %v127_v15, %v127_v15 }
  0xa2   :  { %243 = vst [vmem:[%s322_s2] sm:$0xff] %v242_v16   ;;  %v160_v21 = vadd.f32 %v157_v18, %v156_v13  ;;  %v145_v22 = vadd.f32 %v144_v17, %v125_v12 }
  0xa3   :  { %249 = vst [vmem:[%s322_s2 + $0x8] sm:$0xff] %v247_v19  }
  0xa4   :  { %v146_v23 = vadd.f32 %v145_v22, %v127_v15  ;;  %v161_v25 = vadd.f32 %v160_v21, %v158_v20 }
  0xa6   :  { %v147_v26 = vrot.slane %v146_v23, 4  ;;  %v162_v27 = vadd.f32 %v161_v25, %v159_v24 }
  0xa8   :  { %v148_v28 = vadd.f32 %v147_v26, %v146_v23  ;;  %v163_v29 = vrot.slane %v162_v27, 4 }
  0xaa   :  { %v149_v30 = vrot.slane %v148_v28, 2  ;;  %v164_v31 = vadd.f32 %v163_v29, %v162_v27 }
  0xac   :  { %v150_v32 = vadd.f32 %v149_v30, %v148_v28  ;;  %v165_v33 = vrot.slane %v164_v31, 2 }
  0xae   :  { %v151_v34 = vrot.slane %v150_v32, 1  ;;  %v166_v35 = vadd.f32 %v165_v33, %v164_v31 }
  0xb0   :  { %v152_v37 = vadd.f32 %v151_v34, %v150_v32  ;;  %v167_v38 = vrot.slane %v166_v35, 1 }
  0xb2   :  { %v153_v40 = vadd.f32 %v152_v37, %v143_v36  ;;  %v168_v41 = vadd.f32 %v167_v38, %v166_v35 }
  0xb4   :  { %154 = vst [vmem:[%s321_s3] sm:$0x1] %v153_v40  ;;  %v169_v42 = vadd.f32 %v168_v41, %v155_v39 }
  0xb6   :  { %170 = vst [vmem:[%s321_s3 + $0x1] sm:$0x1] %v169_v42 }

// kernel: forward.19
= control target key start
LH: loop header
LB: loop body
LE: loop exit
PB: predicated region body
PF: predicated region fallthrough
CT: control target
= control target key end

     0   :  { %s137_s1 = inlined_call_operand.vmem [shape: f32[8,128], index: 1, kind: input, shape index: {}]   ;;  %s138_s0 = inlined_call_operand.vmem [shape: bf16[32,128], index: 0, kind: input, shape index: {}, may-alias: {0,3}]   ;;  %s139_s2 = inlined_call_operand.vmem [shape: f32[8,128], index: 2, kind: input, shape index: {}]   ;;  %s140_s3 = inlined_call_operand.vmem [shape: bf16[32,128], index: 3, kind: output, shape index: {}, may-alias: {0,3}]  }
   0x1   :  { %v14_v0 = vld [vmem:[%s137_s1] sm:$0x1]  ;;  %v15_v1 = vld [vmem:[%s137_s1 + $0x1] sm:$0x1]  ;;  %v89_v16 = vld [vmem:[%s138_s0 + $0x8] sm:$0xff]  }
   0x2   :  { %v16_v2 = vmul.f32 0.03125, %v14_v0  ;;  %v17_v3 = vmul.f32 0.03125, %v15_v1  ;;  %v21_v13 = vld [vmem:[%s139_s2] sm:$0x1]  ;;  %v77_v21 = vunpack.c.l.bf16 %v89_v16  ;;  %v34_v22 = vld [vmem:[%s139_s2 + $0x1] sm:$0x1]  ;;  %v78_v23 = vunpack.c.h.bf16 %v89_v16 }
   0x3   :  { %v72_v15 = vld [vmem:[%s138_s0] sm:$0xff]  }
   0x4   :  { %v18_v4 = vmul.f32 %v16_v2, %v16_v2  ;;  %v73_v19 = vunpack.c.l.bf16 %v72_v15  ;;  %v74_v20 = vunpack.c.h.bf16 %v72_v15 }
   0x6   :  { %v19_v5 = vsub.f32 %v17_v3, %v18_v4 }
   0x8   :  { %v20_v6 = vmax.f32 %v19_v5, 0.0 }
   0xa   :  { %v22_v7 = vadd.f32 1e-05, %v20_v6 }
   0xc   :  { %91 = vrsqrt.f32 %v22_v7  ;;  %vm29_vm0 = vweird.f32 %v22_v7 }
  0x12   :  { %v92_v8 = vpop.eup %91 }
  0x13   :  { %v24_v9 = vmul.f32 %v92_v8, %v22_v7  ;;  %vm30_vm1 = vweird.f32 %v92_v8 }
  0x14   :  { %vm31_vm2 = vmor %vm29_vm0, %vm30_vm1 }
  0x15   :  { %v25_v10 = vmul.f32 %v92_v8, %v24_v9 }
  0x17   :  { %v26_v11 = vmul.f32 0.5, %v25_v10 }
  0x19   :  { %v27_v12 = vsub.f32 1.5, %v26_v11 }
  0x1b   :  { %v28_v14 = vmul.f32 %v92_v8, %v27_v12 }
  0x1d   :  { %v32_v17 = vsel %vm31_vm2, %v92_v8, %v28_v14 }
  0x1e   :  { %v33_v18 = vmul.f32 %v32_v17, %v21_v13 }
  0x20   :  { %v35_v24 = vmul.f32 %v33_v18, %v16_v2  ;;  %v45_v25 = vperm.slane %v33_v18, 0 }
  0x22   :  { %v36_v26 = vsub.f32 %v34_v22, %v35_v24  ;;  %v46_v27 = vmul.f32 %v73_v19, %v45_v25  ;;  %v47_v28 = vmul.f32 %v74_v20, %v45_v25  ;;  %v48_v29 = vmul.f32 %v77_v21, %v45_v25 }
  0x23   :  { %v49_v30 = vmul.f32 %v78_v23, %v45_v25 }
  0x24   :  { %v50_v31 = vperm.slane %v36_v26, 0 }
  0x26   :  { %v51_v32 = vadd.f32 %v50_v31, %v46_v27  ;;  %v52_v33 = vadd.f32 %v50_v31, %v47_v28  ;;  %v53_v34 = vadd.f32 %v50_v31, %v48_v29  ;;  %v54_v35 = vadd.f32 %v50_v31, %v49_v30 }
  0x28   :  { %v55_v36 = vmax.f32 %v51_v32, 0.0  ;;  %v56_v37 = vmax.f32 %v52_v33, 0.0  ;;  %v57_v38 = vmax.f32 %v53_v34, 0.0  ;;  %v58_v39 = vmax.f32 %v54_v35, 0.0 }
  0x2a   :  { %v82_v40 = vpack.c.bf16 %v56_v37, %v55_v36  ;;  %v87_v41 = vpack.c.bf16 %v58_v39, %v57_v38 }
  0x2c   :  { %83 = vst [vmem:[%s140_s3] sm:$0xff] %v82_v40  }
  0x2d   :  { %90 = vst [vmem:[%s140_s3 + $0x8] sm:$0xff] %v87_v41  }

// kernel: forward.21
= control target key start
LH: loop header
LB: loop body
LE: loop exit
PB: predicated region body
PF: predicated region fallthrough
CT: control target
= control target key end

     0   :  { %s172_s1 = inlined_call_operand.vmem [shape: f32[8,128], index: 1, kind: input, shape index: {}]   ;;  %s173_s0 = inlined_call_operand.vmem [shape: bf16[32,128], index: 0, kind: input, shape index: {}, may-alias: {0,4}]   ;;  %s174_s2 = inlined_call_operand.vmem [shape: f32[8,128], index: 2, kind: input, shape index: {}]   ;;  %s175_s3 = inlined_call_operand.vmem [shape: bf16[32,128], index: 3, kind: input, shape index: {}]   ;;  %s176_s4 = inlined_call_operand.vmem [shape: bf16[32,128], index: 4, kind: output, shape index: {}, may-alias: {0,4}]  }
   0x1   :  { %v17_v0 = vld [vmem:[%s172_s1] sm:$0x1]  ;;  %v18_v1 = vld [vmem:[%s172_s1 + $0x1] sm:$0x1]  ;;  %v112_v16 = vld [vmem:[%s173_s0 + $0x8] sm:$0xff]  }
   0x2   :  { %v19_v2 = vmul.f32 0.03125, %v17_v0  ;;  %v20_v3 = vmul.f32 0.03125, %v18_v1  ;;  %v24_v13 = vld [vmem:[%s174_s2] sm:$0x1]  ;;  %v92_v21 = vunpack.c.l.bf16 %v112_v16  ;;  %v37_v22 = vld [vmem:[%s174_s2 + $0x1] sm:$0x1]  ;;  %v93_v23 = vunpack.c.h.bf16 %v112_v16 }
   0x3   :  { %v87_v15 = vld [vmem:[%s173_s0] sm:$0xff]   ;;  %v113_v27 = vld [vmem:[%s175_s3 + $0x8] sm:$0xff]  }
   0x4   :  { %v21_v4 = vmul.f32 %v19_v2, %v19_v2  ;;  %v88_v19 = vunpack.c.l.bf16 %v87_v15  ;;  %v89_v20 = vunpack.c.h.bf16 %v87_v15  ;;  %v95_v26 = vld [vmem:[%s175_s3] sm:$0xff]   ;;  %v100_v36 = vunpack.c.l.bf16 %v113_v27 }
   0x5   :  { %v96_v32 = vunpack.c.l.bf16 %v95_v26  ;;  %v97_v35 = vunpack.c.h.bf16 %v95_v26  ;;  %v101_v37 = vunpack.c.h.bf16 %v113_v27 }
   0x6   :  { %v22_v5 = vsub.f32 %v20_v3, %v21_v4 }
   0x8   :  { %v23_v6 = vmax.f32 %v22_v5, 0.0 }
   0xa   :  { %v25_v7 = vadd.f32 1e-05, %v23_v6 }
   0xc   :  { %115 = vrsqrt.f32 %v25_v7  ;;  %vm32_vm0 = vweird.f32 %v25_v7 }
  0x12   :  { %v116_v8 = vpop.eup %115 }
  0x13   :  { %v27_v9 = vmul.f32 %v116_v8, %v25_v7  ;;  %vm33_vm1 = vweird.f32 %v116_v8 }
  0x14   :  { %vm34_vm2 = vmor %vm32_vm0, %vm33_vm1 }
  0x15   :  { %v28_v10 = vmul.f32 %v116_v8, %v27_v9 }
  0x17   :  { %v29_v11 = vmul.f32 0.5, %v28_v10 }
  0x19   :  { %v30_v12 = vsub.f32 1.5, %v29_v11 }
  0x1b   :  { %v31_v14 = vmul.f32 %v116_v8, %v30_v12 }
  0x1d   :  { %v35_v17 = vsel %vm34_vm2, %v116_v8, %v31_v14 }
  0x1e   :  { %v36_v18 = vmul.f32 %v35_v17, %v24_v13 }
  0x20   :  { %v38_v24 = vmul.f32 %v36_v18, %v19_v2  ;;  %v48_v25 = vperm.slane %v36_v18, 0 }
  0x22   :  { %v39_v28 = vsub.f32 %v37_v22, %v38_v24  ;;  %v49_v29 = vmul.f32 %v88_v19, %v48_v25  ;;  %v50_v30 = vmul.f32 %v89_v20, %v48_v25  ;;  %v51_v31 = vmul.f32 %v92_v21, %v48_v25 }
  0x23   :  { %v52_v33 = vmul.f32 %v93_v23, %v48_v25 }
  0x24   :  { %v53_v34 = vperm.slane %v39_v28, 0 }
  0x26   :  { %v54_v38 = vadd.f32 %v53_v34, %v49_v29  ;;  %v55_v39 = vadd.f32 %v53_v34, %v50_v30  ;;  %v56_v40 = vadd.f32 %v53_v34, %v51_v31  ;;  %v57_v41 = vadd.f32 %v53_v34, %v52_v33 }
  0x28   :  { %v66_v42 = vadd.f32 %v96_v32, %v54_v38  ;;  %v67_v43 = vadd.f32 %v97_v35, %v55_v39  ;;  %v68_v44 = vadd.f32 %v100_v36, %v56_v40  ;;  %v69_v45 = vadd.f32 %v101_v37, %v57_v41 }
  0x2a   :  { %v70_v46 = vmax.f32 %v66_v42, 0.0  ;;  %v71_v47 = vmax.f32 %v67_v43, 0.0  ;;  %v72_v48 = vmax.f32 %v68_v44, 0.0  ;;  %v73_v49 = vmax.f32 %v69_v45, 0.0 }
  0x2c   :  { %v105_v50 = vpack.c.bf16 %v71_v47, %v70_v46  ;;  %v110_v51 = vpack.c.bf16 %v73_v49, %v72_v48 }
  0x2e   :  { %106 = vst [vmem:[%s176_s4] sm:$0xff] %v105_v50  }
  0x2f   :  { %114 = vst [vmem:[%s176_s4 + $0x8] sm:$0xff] %v110_v51  }

// kernel: forward.26
= control target key start
LH: loop header
LB: loop body
LE: loop exit
PB: predicated region body
PF: predicated region fallthrough
CT: control target
= control target key end

     0   :  { %vm147_vm0 = vcmask 130048   ;;  %v356_v22 = vmov 0.0   ;;  %s451_s1 = inlined_call_operand.vmem [shape: bf16[144,128], index: 1, kind: input, shape index: {}]   ;;  %s452_s0 = inlined_call_operand.vmem [shape: bf16[32,144], index: 0, kind: input, shape index: {}]   ;;  %s453_s3 = inlined_call_operand.vmem [shape: f32[8,128], index: 3, kind: output, shape index: {1}]   ;;  %s454_s2 = inlined_call_operand.vmem [shape: bf16[32,128], index: 2, kind: output, shape index: {0}]  }
   0x1   :  { %v334_v0 = vld [vmem:[%s451_s1 + $0x38] sm:$0xff]  ;;  %v335_v1 = vld [vmem:[%s451_s1 + $0x40] sm:$0xff]  ;;  %v333_v3 = vld [vmem:[%s451_s1 + $0x30] sm:$0xff]  ;;  %204 = vst [vmem:[%s453_s3] sm:$0xff] %v356_v22 }
   0x2   :  { %v323_v2 = vld [vmem:[%s452_s0 + $0x4] sm:$0xf]  ;;  %154 = vmatpush.bf16.msra.mxu0 %v334_v0  ;;  %347 = vmatpush.bf16.msra.mxu2 %v334_v0  ;;  %v273_v4 = vld [vmem:[%s452_s0 + $0x8] sm:$0xf0]  ;;  %v330_v8 = vld [vmem:[%s451_s1 + $0x18] sm:$0xff] }
   0x3   :  { %180 = vmatpush.bf16.msra.mxu1 %v335_v1  ;;  %v276_v5 = vor.u32 %v323_v2, %v273_v4  ;;  %v332_v6 = vld [vmem:[%s451_s1 + $0x28] sm:$0xff]  ;;  %v331_v7 = vld [vmem:[%s451_s1 + $0x20] sm:$0xff]  ;;  %v325_v9 = vld [vmem:[%s452_s0 + $0x14] sm:$0xf] }
   0x4   :  { %v281_v10 = vld [vmem:[%s452_s0 + $0x18] sm:$0xf0]  ;;  %v329_v11 = vld [vmem:[%s451_s1 + $0x10] sm:$0xff]  ;;  %v328_v13 = vld [vmem:[%s451_s1 + $0x8] sm:$0xff] }
   0x5   :  { %v284_v12 = vor.u32 %v325_v9, %v281_v10  ;;  %v327_v14 = vld [vmem:[%s451_s1] sm:$0xff]  ;;  %v324_v16 = vld [vmem:[%s452_s0 + $0x4] sm:$0xf0]  ;;  %v279_v17 = vld [vmem:[%s452_s0 + $0x10] sm:$0xf] }
   0x6   :  { %155 = vmatpush.bf16.msra.mxu0 %v333_v3  ;;  %348 = vmatpush.bf16.msra.mxu2 %v333_v3  ;;  %v271_v15 = vld [vmem:[%s452_s0] sm:$0xf]  ;;  %v326_v18 = vld [vmem:[%s452_s0 + $0x14] sm:$0xf0] }
   0x7   :  { %321 = vmatmul.msk.bf16.vlgmr.msra.gmra.mxu1 %vm147_vm0, %v276_v5  ;;  %v272_v19 = vor.u32 %v324_v16, %v271_v15  ;;  %v280_v20 = vor.u32 %v326_v18, %v279_v17 }
   0x8   :  { %v205_v55 = vld [vmem:[%s453_s3] sm:$0x1]  ;;  %v217_v58 = vld [vmem:[%s453_s3 + $0x1] sm:$0x1] }
   0xa   :  { %156 = vmatpush.bf16.msra.mxu0 %v332_v6  ;;  %349 = vmatpush.bf16.msra.mxu2 %v332_v6 }
   0xe   :  { %157 = vmatpush.bf16.msra.mxu0 %v331_v7  ;;  %350 = vmatpush.bf16.msra.mxu2 %v331_v7 }
  0x12   :  { %158 = vmatpush.bf16.msra.mxu0 %v330_v8  ;;  %351 = vmatpush.bf16.msra.mxu2 %v330_v8 }
  0x16   :  { %159 = vmatpush.bf16.msra.mxu0 %v329_v11  ;;  %352 = vmatpush.bf16.msra.mxu2 %v329_v11 }
  0x17   :  { %322 = vmatmul.msk.bf16.gmra.mxu1 %vm147_vm0, %v284_v12 }
  0x1a   :  { %160 = vmatpush.bf16.msra.mxu0 %v328_v13  ;;  %353 = vmatpush.bf16.msra.mxu2 %v328_v13 }
  0x1e   :  { %161 = vmatpush.bf16.msra.mxu0 %v327_v14  ;;  %354 = vmatpush.bf16.msra.mxu2 %v327_v14 }
  0x21   :  { %162 = vmatmul.bf16.vlgmr.msra.gmra.mxu0 %v272_v19  ;;  %167 = vmatmul.bf16.vlgmr.msra.gmra.mxu2 %v280_v20 }
  0x84   :  { %v182_v21 = vpop.f32.mrf.mxu1 }
  0x8c   :  { %v184_v23 = vpop.f32.mrf.mxu1 }
  0x94   :  { %v187_v25 = vpop.f32.mrf.mxu1 }
  0x9c   :  { %v189_v36 = vpop.f32.mrf.mxu1 }
  0x9e   :  { %v163_v24 = vpop.f32.mrf.mxu0 }
  0x9f   :  { %v183_v26 = vadd.f32 %v182_v21, %v163_v24 }
  0xa1   :  { %v218_v30 = vmul.f32 %v183_v26, %v183_v26 }
  0xa4   :  { %v168_v27 = vpop.f32.mrf.mxu2 }
  0xa5   :  { %v188_v31 = vadd.f32 %v187_v25, %v168_v27 }
  0xa6   :  { %v165_v28 = vpop.f32.mrf.mxu0 }
  0xa7   :  { %v185_v29 = vadd.f32 %v184_v23, %v165_v28  ;;  %v220_v38 = vmul.f32 %v188_v31, %v188_v31 }
  0xa9   :  { %v339_v32 = vpack.c.bf16 %v185_v29, %v183_v26  ;;  %v206_v33 = vadd.f32 %v185_v29, %v183_v26  ;;  %v219_v34 = vmul.f32 %v185_v29, %v185_v29 }
  0xab   :  { %340 = vst [vmem:[%s454_s2] sm:$0xff] %v339_v32   ;;  %v222_v35 = vadd.f32 %v219_v34, %v218_v30  ;;  %v207_v40 = vadd.f32 %v206_v33, %v188_v31 }
  0xac   :  { %v170_v37 = vpop.f32.mrf.mxu2 }
  0xad   :  { %v190_v39 = vadd.f32 %v189_v36, %v170_v37  ;;  %v223_v44 = vadd.f32 %v222_v35, %v220_v38 }
  0xaf   :  { %v344_v41 = vpack.c.bf16 %v190_v39, %v188_v31  ;;  %v208_v42 = vadd.f32 %v207_v40, %v190_v39  ;;  %v221_v43 = vmul.f32 %v190_v39, %v190_v39 }
  0xb1   :  { %346 = vst [vmem:[%s454_s2 + $0x8] sm:$0xff] %v344_v41   ;;  %v209_v45 = vrot.slane %v208_v42, 4  ;;  %v224_v46 = vadd.f32 %v223_v44, %v221_v43 }
  0xb3   :  { %v210_v47 = vadd.f32 %v209_v45, %v208_v42  ;;  %v225_v48 = vrot.slane %v224_v46, 4 }
  0xb5   :  { %v211_v49 = vrot.slane %v210_v47, 2  ;;  %v226_v50 = vadd.f32 %v225_v48, %v224_v46 }
  0xb7   :  { %v212_v51 = vadd.f32 %v211_v49, %v210_v47  ;;  %v227_v52 = vrot.slane %v226_v50, 2 }
  0xb9   :  { %v213_v53 = vrot.slane %v212_v51, 1  ;;  %v228_v54 = vadd.f32 %v227_v52, %v226_v50 }
  0xbb   :  { %v214_v56 = vadd.f32 %v213_v53, %v212_v51  ;;  %v229_v57 = vrot.slane %v228_v54, 1 }
  0xbd   :  { %v215_v59 = vadd.f32 %v214_v56, %v205_v55  ;;  %v230_v60 = vadd.f32 %v229_v57, %v228_v54 }
  0xbf   :  { %216 = vst [vmem:[%s453_s3] sm:$0x1] %v215_v59  ;;  %v231_v61 = vadd.f32 %v230_v60, %v217_v58 }
  0xc1   :  { %232 = vst [vmem:[%s453_s3 + $0x1] sm:$0x1] %v231_v61 }

</bundles_post_ra>
